<compile_context>
chip_gen: v5e
topology: v5e:2x2
jax: 0.10.0
libtpu: 0.0.40
codegen_flags: <defaults>
</compile_context>

<pallas_src>
import functools
import math

import jax
import jax.numpy as jnp
from jax import lax
from jax.experimental import pallas as pl
from jax.experimental.pallas import tpu as pltpu

KSIZE = 7
PAD = (KSIZE - 1) // 2  # 3


# ---------------------------------------------------------------------------
# Wrapper-side constant builder (conv taps + zero padding baked into matrices)
# ---------------------------------------------------------------------------
def _banded_weights(w, B):
    """w: (2, 7, 7) conv taps.  Returns (2, 7, B, B) banded Toeplitz matrices M with
    M[ch, i, b', b] = w[ch, i, b' - b + 3] inside the 7-wide band, 0 outside, so that
    (plane @ M[ch, i])[a, b] = sum_j w[ch, i, j] * plane[a, b + j - 3]  (zero padded)."""
    d = jnp.arange(B)[:, None] - jnp.arange(B)[None, :] + PAD          # (B, B)
    valid = (d >= 0) & (d < KSIZE)
    taps = jnp.take(w, jnp.clip(d, 0, KSIZE - 1), axis=2)              # (2, 7, B, B)
    return jnp.where(valid[None, None], taps, 0.0).astype(jnp.float32)


# ---------------------------------------------------------------------------
# Kernel helpers
# ---------------------------------------------------------------------------
def _shift_rows(q, delta):
    """result[a, :] = q[a + delta, :]  (rows outside [0, A) read as zero)."""
    if delta == 0:
        return q
    A, B = q.shape
    if abs(delta) >= A:
        return jnp.zeros_like(q)
    pad = jnp.zeros((abs(delta), B), q.dtype)
    if delta > 0:
        return jnp.concatenate([q[delta:, :], pad], axis=0)
    return jnp.concatenate([pad, q[:A + delta, :]], axis=0)


def _conv7x7(p_max, p_mean, band_ref, bias):
    """2-channel 7x7 'same' conv (+ folded BN) of the pooled (A, B) planes.
    Column taps run as banded-Toeplitz matmuls on the MXU; the 7 kernel-row offsets are
    static shifted adds (no shift matrices / extra matmuls)."""
    acc = None
    for i in range(KSIZE):
        q = jnp.dot(p_max, band_ref[0, i], preferred_element_type=jnp.float32)
        q = q + jnp.dot(p_mean, band_ref[1, i], preferred_element_type=jnp.float32)
        q = _shift_rows(q, i - PAD)
        acc = q if acc is None else acc + q
    return acc + jnp.float32(bias)


def _triplet_kernel(x_ref, band_h_ref, band_w_ref, band_s_ref, o_ref, *, biases):
    """One grid step = one batch element of the full TripletAttention forward."""
    b_h, b_w, b_s = biases
    x = x_ref[0].astype(jnp.float32)                                  # (C, H, W)

    # Vectorized channel pools (no per-channel loops, no one-hot placement).
    ps_max, ps_mean = jnp.max(x, axis=0), jnp.mean(x, axis=0)         # (H, W) SpatialGate
    ph_max, ph_mean = jnp.max(x, axis=1), jnp.mean(x, axis=1)         # (C, W) ChannelGateH
    pw_max, pw_mean = jnp.max(x, axis=2), jnp.mean(x, axis=2)         # (C, H) ChannelGateW

    # 7x7 "same" convs (+ folded BN) on the MXU, then sigmoid.
    s_hw = jax.nn.sigmoid(_conv7x7(ps_max, ps_mean, band_s_ref, b_s))  # (H, W)
    s_cw = jax.nn.sigmoid(_conv7x7(ph_max, ph_mean, band_h_ref, b_h))  # (C, W)
    s_ch = jax.nn.sigmoid(_conv7x7(pw_max, pw_mean, band_w_ref, b_w))  # (C, H)

    # Fused rescale + 3-branch average: one broadcast add, one vectorized store.
    scale = (s_hw[None, :, :] + s_cw[:, None, :] + s_ch[:, :, None]) * jnp.float32(1.0 / 3.0)
    o_ref[0] = (x * scale).astype(o_ref.dtype)


# ---------------------------------------------------------------------------
# Public wrapper
# ---------------------------------------------------------------------------
def triplet_attention(x, w_h, w_w, w_s, b_h=0.0, b_w=0.0, b_s=0.0):
    """x: (N, C, H, W) float32 (NCHW); w_*: (2, 7, 7) BN-folded conv weights;
    b_*: scalar folded-BN biases (0 for fresh eval-mode BN stats)."""
    N, C, H, W = x.shape
    band_h = _banded_weights(w_h, W)                              # ChannelGateH: (C, W) plane
    band_w = _banded_weights(jnp.transpose(w_w, (0, 2, 1)), H)    # ChannelGateW: (C, H) plane
    band_s = _banded_weights(w_s, W)                              # SpatialGate : (H, W) plane

    kernel = functools.partial(
        _triplet_kernel, biases=(float(b_h), float(b_w), float(b_s)))

    # Scoped-VMEM budget: double-buffered in/out blocks + constants + f32 working set.
    elem = jnp.dtype(x.dtype).itemsize
    block_bytes = C * H * W * elem
    const_bytes = (band_h.size + band_w.size + band_s.size) * 4
    vmem_need = 4 * block_bytes + 2 * const_bytes + 4 * C * H * W * 4 + (1 << 20)
    vmem_limit = int(min(max(vmem_need, 32 * 1024 * 1024), 100 * 1024 * 1024))

    def _const_spec(shape):
        nd = len(shape)
        return pl.BlockSpec(shape, lambda n, _nd=nd: (0,) * _nd)

    return pl.pallas_call(
        kernel,
        out_shape=jax.ShapeDtypeStruct(x.shape, x.dtype),
        grid=(N,),
        in_specs=[
            pl.BlockSpec((1, C, H, W), lambda n: (n, 0, 0, 0)),
            _const_spec(band_h.shape),
            _const_spec(band_w.shape),
            _const_spec(band_s.shape),
        ],
        out_specs=pl.BlockSpec((1, C, H, W), lambda n: (n, 0, 0, 0)),
        compiler_params=pltpu.CompilerParams(
            dimension_semantics=("parallel",),
            vmem_limit_bytes=vmem_limit,
        ),
    )(x, band_h, band_w, band_s)


def make_gate_params(key):
    """Conv2d(2, 1, 7, bias=False) weight with BatchNorm2d (eval, fresh stats) folded."""
    fan_in = 2 * KSIZE * KSIZE
    w = jax.random.normal(key, (2, KSIZE, KSIZE), jnp.float32) / math.sqrt(fan_in)
    bn_scale = 1.0 / math.sqrt(1.0 + 1e-5)   # gamma=1, running_var=1, eps=1e-5
    return w * bn_scale                      # (2, 7, 7)


# ---------------------------------------------------------------------------
# Pure-JAX reference (for a loose numerical check)
# ---------------------------------------------------------------------------
def _spatial_gate_ref(x, w):
    mx = jnp.max(x, axis=1)
    mn = jnp.mean(x, axis=1)
    pooled = jnp.stack([mx, mn], axis=1)                        # (N, 2, A, B)
    conv = lax.conv_general_dilated(
        pooled, w[None].astype(jnp.float32), window_strides=(1, 1),
        padding=[(PAD, PAD), (PAD, PAD)],
        dimension_numbers=("NCHW", "OIHW", "NCHW"),
        precision=lax.Precision.HIGHEST)
    return x * jax.nn.sigmoid(conv)                             # broadcast over dim 1


def _reference(x, w_h, w_w, w_s):
    o1 = jnp.transpose(_spatial_gate_ref(jnp.transpose(x, (0, 2, 1, 3)), w_h), (0, 2, 1, 3))
    o2 = jnp.transpose(_spatial_gate_ref(jnp.transpose(x, (0, 3, 2, 1)), w_w), (0, 3, 2, 1))
    o3 = _spatial_gate_ref(x, w_s)
    return (o1 + o2 + o3) / 3.0


if __name__ == "__main__":
    key = jax.random.PRNGKey(0)
    kx, k1, k2, k3 = jax.random.split(key, 4)

    N, C, H, W = 2, 4, 16, 16
    x = jax.random.normal(kx, (N, C, H, W), jnp.float32)

    w_h = make_gate_params(k1)   # ChannelGateH
    w_w = make_gate_params(k2)   # ChannelGateW
    w_s = make_gate_params(k3)   # SpatialGate

    out = jax.jit(triplet_attention)(x, w_h, w_w, w_s)
    jax.block_until_ready(out)
    assert out.shape == (N, C, H, W) and out.dtype == jnp.float32

    # Loose tolerance: the in-kernel convs run on the MXU, the reference uses
    # HIGHEST-precision XLA conv.
    ref = _reference(x, w_h, w_w, w_s)
    err = float(jnp.max(jnp.abs(out - ref)))
    assert err < 5e-2, f"max abs err vs reference: {err}"

    print("KERNEL_OK")
</pallas_src>

<mosaic_0001>
module attributes {stable_mosaic.version = 11 : i64} {
  func.func @_triplet_kernel(%arg0: i32, %arg1: memref<1x4x16x16xf32, #tpu.memory_space<vmem>>, %arg2: memref<2x7x16x16xf32, #tpu.memory_space<vmem>>, %arg3: memref<2x7x16x16xf32, #tpu.memory_space<vmem>>, %arg4: memref<2x7x16x16xf32, #tpu.memory_space<vmem>>, %arg5: memref<1x4x16x16xf32, #tpu.memory_space<vmem>>) attributes {dimension_semantics = [#tpu.dimension_semantics<parallel>], iteration_bounds = array<i64: 2>, scalar_prefetch = 0 : i64, scratch_operands = 0 : i64, tpu.core_type = #tpu.core_type<tc>, window_params = [{transform_indices = @transform_0, window_bounds = array<i64: 1, 4, 16, 16>}, {pipeline_mode = #tpu.pipeline_mode<synchronous>, transform_indices = @transform_1, window_bounds = array<i64: 2, 7, 16, 16>}, {pipeline_mode = #tpu.pipeline_mode<synchronous>, transform_indices = @transform_2, window_bounds = array<i64: 2, 7, 16, 16>}, {pipeline_mode = #tpu.pipeline_mode<synchronous>, transform_indices = @transform_3, window_bounds = array<i64: 2, 7, 16, 16>}, {transform_indices = @transform_4, window_bounds = array<i64: 1, 4, 16, 16>}]} {
    %c0 = arith.constant 0 : index
    %c0_0 = arith.constant 0 : index
    %c0_1 = arith.constant 0 : index
    %c0_2 = arith.constant 0 : index
    %0 = vector.load %arg1[%c0, %c0_0, %c0_1, %c0_2] : memref<1x4x16x16xf32, #tpu.memory_space<vmem>>, vector<1x4x16x16xf32>
    %1 = vector.shape_cast %0 : vector<1x4x16x16xf32> to vector<4x16x16xf32>
    %cst = arith.constant dense<0xFF800000> : vector<16x16xf32>
    %2 = vector.multi_reduction <maximumf>, %1, %cst [0] : vector<4x16x16xf32> to vector<16x16xf32>
    %cst_3 = arith.constant dense<0.000000e+00> : vector<16x16xf32>
    %3 = vector.multi_reduction <add>, %1, %cst_3 [0] : vector<4x16x16xf32> to vector<16x16xf32>
    %cst_4 = arith.constant 4.000000e+00 : f32
    %4 = vector.broadcast %cst_4 : f32 to vector<16x16xf32>
    %5 = arith.divf %3, %4 : vector<16x16xf32>
    %cst_5 = arith.constant dense<0xFF800000> : vector<4x16xf32>
    %6 = vector.multi_reduction <maximumf>, %1, %cst_5 [1] : vector<4x16x16xf32> to vector<4x16xf32>
    %cst_6 = arith.constant dense<0.000000e+00> : vector<4x16xf32>
    %7 = vector.multi_reduction <add>, %1, %cst_6 [1] : vector<4x16x16xf32> to vector<4x16xf32>
    %cst_7 = arith.constant 1.600000e+01 : f32
    %8 = vector.broadcast %cst_7 : f32 to vector<4x16xf32>
    %9 = arith.divf %7, %8 : vector<4x16xf32>
    %cst_8 = arith.constant dense<0xFF800000> : vector<4x16xf32>
    %10 = vector.multi_reduction <maximumf>, %1, %cst_8 [2] : vector<4x16x16xf32> to vector<4x16xf32>
    %cst_9 = arith.constant dense<0.000000e+00> : vector<4x16xf32>
    %11 = vector.multi_reduction <add>, %1, %cst_9 [2] : vector<4x16x16xf32> to vector<4x16xf32>
    %cst_10 = arith.constant 1.600000e+01 : f32
    %12 = vector.broadcast %cst_10 : f32 to vector<4x16xf32>
    %13 = arith.divf %11, %12 : vector<4x16xf32>
    %c0_11 = arith.constant 0 : index
    %c0_12 = arith.constant 0 : index
    %c0_13 = arith.constant 0 : index
    %c0_14 = arith.constant 0 : index
    %14 = vector.load %arg4[%c0_11, %c0_12, %c0_13, %c0_14] : memref<2x7x16x16xf32, #tpu.memory_space<vmem>>, vector<1x1x16x16xf32>
    %15 = vector.shape_cast %14 : vector<1x1x16x16xf32> to vector<16x16xf32>
    %cst_15 = arith.constant dense<0.000000e+00> : vector<16x16xf32>
    %16 = tpu.matmul %2, %15, %cst_15 {dimension_numbers = #tpu.dot_dimension_numbers<[1], [0], [0], [1], [0, 0, 1, 1], [], []>} : vector<16x16xf32>, vector<16x16xf32>, vector<16x16xf32> -> vector<16x16xf32>
    %c1 = arith.constant 1 : index
    %c0_16 = arith.constant 0 : index
    %c0_17 = arith.constant 0 : index
    %c0_18 = arith.constant 0 : index
    %17 = vector.load %arg4[%c1, %c0_16, %c0_17, %c0_18] : memref<2x7x16x16xf32, #tpu.memory_space<vmem>>, vector<1x1x16x16xf32>
    %18 = vector.shape_cast %17 : vector<1x1x16x16xf32> to vector<16x16xf32>
    %cst_19 = arith.constant dense<0.000000e+00> : vector<16x16xf32>
    %19 = tpu.matmul %5, %18, %cst_19 {dimension_numbers = #tpu.dot_dimension_numbers<[1], [0], [0], [1], [0, 0, 1, 1], [], []>} : vector<16x16xf32>, vector<16x16xf32>, vector<16x16xf32> -> vector<16x16xf32>
    %20 = arith.addf %16, %19 : vector<16x16xf32>
    %cst_20 = arith.constant 0.000000e+00 : f32
    %21 = vector.broadcast %cst_20 : f32 to vector<3x16xf32>
    %22 = vector.extract_strided_slice %20 {offsets = [0, 0], sizes = [13, 16], strides = [1, 1]} : vector<16x16xf32> to vector<13x16xf32>
    %23 = tpu.concatenate %21, %22 in 0 : vector<3x16xf32>, vector<13x16xf32> -> vector<16x16xf32>
    %c0_21 = arith.constant 0 : index
    %c1_22 = arith.constant 1 : index
    %c0_23 = arith.constant 0 : index
    %c0_24 = arith.constant 0 : index
    %24 = vector.load %arg4[%c0_21, %c1_22, %c0_23, %c0_24] : memref<2x7x16x16xf32, #tpu.memory_space<vmem>>, vector<1x1x16x16xf32>
    %25 = vector.shape_cast %24 : vector<1x1x16x16xf32> to vector<16x16xf32>
    %cst_25 = arith.constant dense<0.000000e+00> : vector<16x16xf32>
    %26 = tpu.matmul %2, %25, %cst_25 {dimension_numbers = #tpu.dot_dimension_numbers<[1], [0], [0], [1], [0, 0, 1, 1], [], []>} : vector<16x16xf32>, vector<16x16xf32>, vector<16x16xf32> -> vector<16x16xf32>
    %c1_26 = arith.constant 1 : index
    %c1_27 = arith.constant 1 : index
    %c0_28 = arith.constant 0 : index
    %c0_29 = arith.constant 0 : index
    %27 = vector.load %arg4[%c1_26, %c1_27, %c0_28, %c0_29] : memref<2x7x16x16xf32, #tpu.memory_space<vmem>>, vector<1x1x16x16xf32>
    %28 = vector.shape_cast %27 : vector<1x1x16x16xf32> to vector<16x16xf32>
    %cst_30 = arith.constant dense<0.000000e+00> : vector<16x16xf32>
    %29 = tpu.matmul %5, %28, %cst_30 {dimension_numbers = #tpu.dot_dimension_numbers<[1], [0], [0], [1], [0, 0, 1, 1], [], []>} : vector<16x16xf32>, vector<16x16xf32>, vector<16x16xf32> -> vector<16x16xf32>
    %30 = arith.addf %26, %29 : vector<16x16xf32>
    %cst_31 = arith.constant 0.000000e+00 : f32
    %31 = vector.broadcast %cst_31 : f32 to vector<2x16xf32>
    %32 = vector.extract_strided_slice %30 {offsets = [0, 0], sizes = [14, 16], strides = [1, 1]} : vector<16x16xf32> to vector<14x16xf32>
    %33 = tpu.concatenate %31, %32 in 0 : vector<2x16xf32>, vector<14x16xf32> -> vector<16x16xf32>
    %34 = arith.addf %23, %33 : vector<16x16xf32>
    %c0_32 = arith.constant 0 : index
    %c2 = arith.constant 2 : index
    %c0_33 = arith.constant 0 : index
    %c0_34 = arith.constant 0 : index
    %35 = vector.load %arg4[%c0_32, %c2, %c0_33, %c0_34] : memref<2x7x16x16xf32, #tpu.memory_space<vmem>>, vector<1x1x16x16xf32>
    %36 = vector.shape_cast %35 : vector<1x1x16x16xf32> to vector<16x16xf32>
    %cst_35 = arith.constant dense<0.000000e+00> : vector<16x16xf32>
    %37 = tpu.matmul %2, %36, %cst_35 {dimension_numbers = #tpu.dot_dimension_numbers<[1], [0], [0], [1], [0, 0, 1, 1], [], []>} : vector<16x16xf32>, vector<16x16xf32>, vector<16x16xf32> -> vector<16x16xf32>
    %c1_36 = arith.constant 1 : index
    %c2_37 = arith.constant 2 : index
    %c0_38 = arith.constant 0 : index
    %c0_39 = arith.constant 0 : index
    %38 = vector.load %arg4[%c1_36, %c2_37, %c0_38, %c0_39] : memref<2x7x16x16xf32, #tpu.memory_space<vmem>>, vector<1x1x16x16xf32>
    %39 = vector.shape_cast %38 : vector<1x1x16x16xf32> to vector<16x16xf32>
    %cst_40 = arith.constant dense<0.000000e+00> : vector<16x16xf32>
    %40 = tpu.matmul %5, %39, %cst_40 {dimension_numbers = #tpu.dot_dimension_numbers<[1], [0], [0], [1], [0, 0, 1, 1], [], []>} : vector<16x16xf32>, vector<16x16xf32>, vector<16x16xf32> -> vector<16x16xf32>
    %41 = arith.addf %37, %40 : vector<16x16xf32>
    %cst_41 = arith.constant 0.000000e+00 : f32
    %42 = vector.broadcast %cst_41 : f32 to vector<1x16xf32>
    %43 = vector.extract_strided_slice %41 {offsets = [0, 0], sizes = [15, 16], strides = [1, 1]} : vector<16x16xf32> to vector<15x16xf32>
    %44 = tpu.concatenate %42, %43 in 0 : vector<1x16xf32>, vector<15x16xf32> -> vector<16x16xf32>
    %45 = arith.addf %34, %44 : vector<16x16xf32>
    %c0_42 = arith.constant 0 : index
    %c3 = arith.constant 3 : index
    %c0_43 = arith.constant 0 : index
    %c0_44 = arith.constant 0 : index
    %46 = vector.load %arg4[%c0_42, %c3, %c0_43, %c0_44] : memref<2x7x16x16xf32, #tpu.memory_space<vmem>>, vector<1x1x16x16xf32>
    %47 = vector.shape_cast %46 : vector<1x1x16x16xf32> to vector<16x16xf32>
    %cst_45 = arith.constant dense<0.000000e+00> : vector<16x16xf32>
    %48 = tpu.matmul %2, %47, %cst_45 {dimension_numbers = #tpu.dot_dimension_numbers<[1], [0], [0], [1], [0, 0, 1, 1], [], []>} : vector<16x16xf32>, vector<16x16xf32>, vector<16x16xf32> -> vector<16x16xf32>
    %c1_46 = arith.constant 1 : index
    %c3_47 = arith.constant 3 : index
    %c0_48 = arith.constant 0 : index
    %c0_49 = arith.constant 0 : index
    %49 = vector.load %arg4[%c1_46, %c3_47, %c0_48, %c0_49] : memref<2x7x16x16xf32, #tpu.memory_space<vmem>>, vector<1x1x16x16xf32>
    %50 = vector.shape_cast %49 : vector<1x1x16x16xf32> to vector<16x16xf32>
    %cst_50 = arith.constant dense<0.000000e+00> : vector<16x16xf32>
    %51 = tpu.matmul %5, %50, %cst_50 {dimension_numbers = #tpu.dot_dimension_numbers<[1], [0], [0], [1], [0, 0, 1, 1], [], []>} : vector<16x16xf32>, vector<16x16xf32>, vector<16x16xf32> -> vector<16x16xf32>
    %52 = arith.addf %48, %51 : vector<16x16xf32>
    %53 = arith.addf %45, %52 : vector<16x16xf32>
    %c0_51 = arith.constant 0 : index
    %c4 = arith.constant 4 : index
    %c0_52 = arith.constant 0 : index
    %c0_53 = arith.constant 0 : index
    %54 = vector.load %arg4[%c0_51, %c4, %c0_52, %c0_53] : memref<2x7x16x16xf32, #tpu.memory_space<vmem>>, vector<1x1x16x16xf32>
    %55 = vector.shape_cast %54 : vector<1x1x16x16xf32> to vector<16x16xf32>
    %cst_54 = arith.constant dense<0.000000e+00> : vector<16x16xf32>
    %56 = tpu.matmul %2, %55, %cst_54 {dimension_numbers = #tpu.dot_dimension_numbers<[1], [0], [0], [1], [0, 0, 1, 1], [], []>} : vector<16x16xf32>, vector<16x16xf32>, vector<16x16xf32> -> vector<16x16xf32>
    %c1_55 = arith.constant 1 : index
    %c4_56 = arith.constant 4 : index
    %c0_57 = arith.constant 0 : index
    %c0_58 = arith.constant 0 : index
    %57 = vector.load %arg4[%c1_55, %c4_56, %c0_57, %c0_58] : memref<2x7x16x16xf32, #tpu.memory_space<vmem>>, vector<1x1x16x16xf32>
    %58 = vector.shape_cast %57 : vector<1x1x16x16xf32> to vector<16x16xf32>
    %cst_59 = arith.constant dense<0.000000e+00> : vector<16x16xf32>
    %59 = tpu.matmul %5, %58, %cst_59 {dimension_numbers = #tpu.dot_dimension_numbers<[1], [0], [0], [1], [0, 0, 1, 1], [], []>} : vector<16x16xf32>, vector<16x16xf32>, vector<16x16xf32> -> vector<16x16xf32>
    %60 = arith.addf %56, %59 : vector<16x16xf32>
    %cst_60 = arith.constant 0.000000e+00 : f32
    %61 = vector.broadcast %cst_60 : f32 to vector<1x16xf32>
    %62 = vector.extract_strided_slice %60 {offsets = [1, 0], sizes = [15, 16], strides = [1, 1]} : vector<16x16xf32> to vector<15x16xf32>
    %63 = tpu.concatenate %62, %61 in 0 : vector<15x16xf32>, vector<1x16xf32> -> vector<16x16xf32>
    %64 = arith.addf %53, %63 : vector<16x16xf32>
    %c0_61 = arith.constant 0 : index
    %c5 = arith.constant 5 : index
    %c0_62 = arith.constant 0 : index
    %c0_63 = arith.constant 0 : index
    %65 = vector.load %arg4[%c0_61, %c5, %c0_62, %c0_63] : memref<2x7x16x16xf32, #tpu.memory_space<vmem>>, vector<1x1x16x16xf32>
    %66 = vector.shape_cast %65 : vector<1x1x16x16xf32> to vector<16x16xf32>
    %cst_64 = arith.constant dense<0.000000e+00> : vector<16x16xf32>
    %67 = tpu.matmul %2, %66, %cst_64 {dimension_numbers = #tpu.dot_dimension_numbers<[1], [0], [0], [1], [0, 0, 1, 1], [], []>} : vector<16x16xf32>, vector<16x16xf32>, vector<16x16xf32> -> vector<16x16xf32>
    %c1_65 = arith.constant 1 : index
    %c5_66 = arith.constant 5 : index
    %c0_67 = arith.constant 0 : index
    %c0_68 = arith.constant 0 : index
    %68 = vector.load %arg4[%c1_65, %c5_66, %c0_67, %c0_68] : memref<2x7x16x16xf32, #tpu.memory_space<vmem>>, vector<1x1x16x16xf32>
    %69 = vector.shape_cast %68 : vector<1x1x16x16xf32> to vector<16x16xf32>
    %cst_69 = arith.constant dense<0.000000e+00> : vector<16x16xf32>
    %70 = tpu.matmul %5, %69, %cst_69 {dimension_numbers = #tpu.dot_dimension_numbers<[1], [0], [0], [1], [0, 0, 1, 1], [], []>} : vector<16x16xf32>, vector<16x16xf32>, vector<16x16xf32> -> vector<16x16xf32>
    %71 = arith.addf %67, %70 : vector<16x16xf32>
    %cst_70 = arith.constant 0.000000e+00 : f32
    %72 = vector.broadcast %cst_70 : f32 to vector<2x16xf32>
    %73 = vector.extract_strided_slice %71 {offsets = [2, 0], sizes = [14, 16], strides = [1, 1]} : vector<16x16xf32> to vector<14x16xf32>
    %74 = tpu.concatenate %73, %72 in 0 : vector<14x16xf32>, vector<2x16xf32> -> vector<16x16xf32>
    %75 = arith.addf %64, %74 : vector<16x16xf32>
    %c0_71 = arith.constant 0 : index
    %c6 = arith.constant 6 : index
    %c0_72 = arith.constant 0 : index
    %c0_73 = arith.constant 0 : index
    %76 = vector.load %arg4[%c0_71, %c6, %c0_72, %c0_73] : memref<2x7x16x16xf32, #tpu.memory_space<vmem>>, vector<1x1x16x16xf32>
    %77 = vector.shape_cast %76 : vector<1x1x16x16xf32> to vector<16x16xf32>
    %cst_74 = arith.constant dense<0.000000e+00> : vector<16x16xf32>
    %78 = tpu.matmul %2, %77, %cst_74 {dimension_numbers = #tpu.dot_dimension_numbers<[1], [0], [0], [1], [0, 0, 1, 1], [], []>} : vector<16x16xf32>, vector<16x16xf32>, vector<16x16xf32> -> vector<16x16xf32>
    %c1_75 = arith.constant 1 : index
    %c6_76 = arith.constant 6 : index
    %c0_77 = arith.constant 0 : index
    %c0_78 = arith.constant 0 : index
    %79 = vector.load %arg4[%c1_75, %c6_76, %c0_77, %c0_78] : memref<2x7x16x16xf32, #tpu.memory_space<vmem>>, vector<1x1x16x16xf32>
    %80 = vector.shape_cast %79 : vector<1x1x16x16xf32> to vector<16x16xf32>
    %cst_79 = arith.constant dense<0.000000e+00> : vector<16x16xf32>
    %81 = tpu.matmul %5, %80, %cst_79 {dimension_numbers = #tpu.dot_dimension_numbers<[1], [0], [0], [1], [0, 0, 1, 1], [], []>} : vector<16x16xf32>, vector<16x16xf32>, vector<16x16xf32> -> vector<16x16xf32>
    %82 = arith.addf %78, %81 : vector<16x16xf32>
    %cst_80 = arith.constant 0.000000e+00 : f32
    %83 = vector.broadcast %cst_80 : f32 to vector<3x16xf32>
    %84 = vector.extract_strided_slice %82 {offsets = [3, 0], sizes = [13, 16], strides = [1, 1]} : vector<16x16xf32> to vector<13x16xf32>
    %85 = tpu.concatenate %84, %83 in 0 : vector<13x16xf32>, vector<3x16xf32> -> vector<16x16xf32>
    %86 = arith.addf %75, %85 : vector<16x16xf32>
    %cst_81 = arith.constant 0.000000e+00 : f32
    %87 = vector.broadcast %cst_81 : f32 to vector<16x16xf32>
    %88 = arith.addf %86, %87 : vector<16x16xf32>
    %89 = arith.negf %88 : vector<16x16xf32>
    %90 = math.exp %89 : vector<16x16xf32>
    %cst_82 = arith.constant 1.000000e+00 : f32
    %91 = vector.broadcast %cst_82 : f32 to vector<16x16xf32>
    %92 = arith.addf %91, %90 : vector<16x16xf32>
    %93 = arith.divf %91, %92 : vector<16x16xf32>
    %c0_83 = arith.constant 0 : index
    %c0_84 = arith.constant 0 : index
    %c0_85 = arith.constant 0 : index
    %c0_86 = arith.constant 0 : index
    %94 = vector.load %arg2[%c0_83, %c0_84, %c0_85, %c0_86] : memref<2x7x16x16xf32, #tpu.memory_space<vmem>>, vector<1x1x16x16xf32>
    %95 = vector.shape_cast %94 : vector<1x1x16x16xf32> to vector<16x16xf32>
    %cst_87 = arith.constant dense<0.000000e+00> : vector<4x16xf32>
    %96 = tpu.matmul %6, %95, %cst_87 {dimension_numbers = #tpu.dot_dimension_numbers<[1], [0], [0], [1], [0, 0, 1, 1], [], []>} : vector<4x16xf32>, vector<16x16xf32>, vector<4x16xf32> -> vector<4x16xf32>
    %c1_88 = arith.constant 1 : index
    %c0_89 = arith.constant 0 : index
    %c0_90 = arith.constant 0 : index
    %c0_91 = arith.constant 0 : index
    %97 = vector.load %arg2[%c1_88, %c0_89, %c0_90, %c0_91] : memref<2x7x16x16xf32, #tpu.memory_space<vmem>>, vector<1x1x16x16xf32>
    %98 = vector.shape_cast %97 : vector<1x1x16x16xf32> to vector<16x16xf32>
    %cst_92 = arith.constant dense<0.000000e+00> : vector<4x16xf32>
    %99 = tpu.matmul %9, %98, %cst_92 {dimension_numbers = #tpu.dot_dimension_numbers<[1], [0], [0], [1], [0, 0, 1, 1], [], []>} : vector<4x16xf32>, vector<16x16xf32>, vector<4x16xf32> -> vector<4x16xf32>
    %100 = arith.addf %96, %99 : vector<4x16xf32>
    %cst_93 = arith.constant 0.000000e+00 : f32
    %101 = vector.broadcast %cst_93 : f32 to vector<3x16xf32>
    %102 = vector.extract_strided_slice %100 {offsets = [0, 0], sizes = [1, 16], strides = [1, 1]} : vector<4x16xf32> to vector<1x16xf32>
    %103 = tpu.concatenate %101, %102 in 0 : vector<3x16xf32>, vector<1x16xf32> -> vector<4x16xf32>
    %c0_94 = arith.constant 0 : index
    %c1_95 = arith.constant 1 : index
    %c0_96 = arith.constant 0 : index
    %c0_97 = arith.constant 0 : index
    %104 = vector.load %arg2[%c0_94, %c1_95, %c0_96, %c0_97] : memref<2x7x16x16xf32, #tpu.memory_space<vmem>>, vector<1x1x16x16xf32>
    %105 = vector.shape_cast %104 : vector<1x1x16x16xf32> to vector<16x16xf32>
    %cst_98 = arith.constant dense<0.000000e+00> : vector<4x16xf32>
    %106 = tpu.matmul %6, %105, %cst_98 {dimension_numbers = #tpu.dot_dimension_numbers<[1], [0], [0], [1], [0, 0, 1, 1], [], []>} : vector<4x16xf32>, vector<16x16xf32>, vector<4x16xf32> -> vector<4x16xf32>
    %c1_99 = arith.constant 1 : index
    %c1_100 = arith.constant 1 : index
    %c0_101 = arith.constant 0 : index
    %c0_102 = arith.constant 0 : index
    %107 = vector.load %arg2[%c1_99, %c1_100, %c0_101, %c0_102] : memref<2x7x16x16xf32, #tpu.memory_space<vmem>>, vector<1x1x16x16xf32>
    %108 = vector.shape_cast %107 : vector<1x1x16x16xf32> to vector<16x16xf32>
    %cst_103 = arith.constant dense<0.000000e+00> : vector<4x16xf32>
    %109 = tpu.matmul %9, %108, %cst_103 {dimension_numbers = #tpu.dot_dimension_numbers<[1], [0], [0], [1], [0, 0, 1, 1], [], []>} : vector<4x16xf32>, vector<16x16xf32>, vector<4x16xf32> -> vector<4x16xf32>
    %110 = arith.addf %106, %109 : vector<4x16xf32>
    %cst_104 = arith.constant 0.000000e+00 : f32
    %111 = vector.broadcast %cst_104 : f32 to vector<2x16xf32>
    %112 = vector.extract_strided_slice %110 {offsets = [0, 0], sizes = [2, 16], strides = [1, 1]} : vector<4x16xf32> to vector<2x16xf32>
    %113 = tpu.concatenate %111, %112 in 0 : vector<2x16xf32>, vector<2x16xf32> -> vector<4x16xf32>
    %114 = arith.addf %103, %113 : vector<4x16xf32>
    %c0_105 = arith.constant 0 : index
    %c2_106 = arith.constant 2 : index
    %c0_107 = arith.constant 0 : index
    %c0_108 = arith.constant 0 : index
    %115 = vector.load %arg2[%c0_105, %c2_106, %c0_107, %c0_108] : memref<2x7x16x16xf32, #tpu.memory_space<vmem>>, vector<1x1x16x16xf32>
    %116 = vector.shape_cast %115 : vector<1x1x16x16xf32> to vector<16x16xf32>
    %cst_109 = arith.constant dense<0.000000e+00> : vector<4x16xf32>
    %117 = tpu.matmul %6, %116, %cst_109 {dimension_numbers = #tpu.dot_dimension_numbers<[1], [0], [0], [1], [0, 0, 1, 1], [], []>} : vector<4x16xf32>, vector<16x16xf32>, vector<4x16xf32> -> vector<4x16xf32>
    %c1_110 = arith.constant 1 : index
    %c2_111 = arith.constant 2 : index
    %c0_112 = arith.constant 0 : index
    %c0_113 = arith.constant 0 : index
    %118 = vector.load %arg2[%c1_110, %c2_111, %c0_112, %c0_113] : memref<2x7x16x16xf32, #tpu.memory_space<vmem>>, vector<1x1x16x16xf32>
    %119 = vector.shape_cast %118 : vector<1x1x16x16xf32> to vector<16x16xf32>
    %cst_114 = arith.constant dense<0.000000e+00> : vector<4x16xf32>
    %120 = tpu.matmul %9, %119, %cst_114 {dimension_numbers = #tpu.dot_dimension_numbers<[1], [0], [0], [1], [0, 0, 1, 1], [], []>} : vector<4x16xf32>, vector<16x16xf32>, vector<4x16xf32> -> vector<4x16xf32>
    %121 = arith.addf %117, %120 : vector<4x16xf32>
    %cst_115 = arith.constant 0.000000e+00 : f32
    %122 = vector.broadcast %cst_115 : f32 to vector<1x16xf32>
    %123 = vector.extract_strided_slice %121 {offsets = [0, 0], sizes = [3, 16], strides = [1, 1]} : vector<4x16xf32> to vector<3x16xf32>
    %124 = tpu.concatenate %122, %123 in 0 : vector<1x16xf32>, vector<3x16xf32> -> vector<4x16xf32>
    %125 = arith.addf %114, %124 : vector<4x16xf32>
    %c0_116 = arith.constant 0 : index
    %c3_117 = arith.constant 3 : index
    %c0_118 = arith.constant 0 : index
    %c0_119 = arith.constant 0 : index
    %126 = vector.load %arg2[%c0_116, %c3_117, %c0_118, %c0_119] : memref<2x7x16x16xf32, #tpu.memory_space<vmem>>, vector<1x1x16x16xf32>
    %127 = vector.shape_cast %126 : vector<1x1x16x16xf32> to vector<16x16xf32>
    %cst_120 = arith.constant dense<0.000000e+00> : vector<4x16xf32>
    %128 = tpu.matmul %6, %127, %cst_120 {dimension_numbers = #tpu.dot_dimension_numbers<[1], [0], [0], [1], [0, 0, 1, 1], [], []>} : vector<4x16xf32>, vector<16x16xf32>, vector<4x16xf32> -> vector<4x16xf32>
    %c1_121 = arith.constant 1 : index
    %c3_122 = arith.constant 3 : index
    %c0_123 = arith.constant 0 : index
    %c0_124 = arith.constant 0 : index
    %129 = vector.load %arg2[%c1_121, %c3_122, %c0_123, %c0_124] : memref<2x7x16x16xf32, #tpu.memory_space<vmem>>, vector<1x1x16x16xf32>
    %130 = vector.shape_cast %129 : vector<1x1x16x16xf32> to vector<16x16xf32>
    %cst_125 = arith.constant dense<0.000000e+00> : vector<4x16xf32>
    %131 = tpu.matmul %9, %130, %cst_125 {dimension_numbers = #tpu.dot_dimension_numbers<[1], [0], [0], [1], [0, 0, 1, 1], [], []>} : vector<4x16xf32>, vector<16x16xf32>, vector<4x16xf32> -> vector<4x16xf32>
    %132 = arith.addf %128, %131 : vector<4x16xf32>
    %133 = arith.addf %125, %132 : vector<4x16xf32>
    %c0_126 = arith.constant 0 : index
    %c4_127 = arith.constant 4 : index
    %c0_128 = arith.constant 0 : index
    %c0_129 = arith.constant 0 : index
    %134 = vector.load %arg2[%c0_126, %c4_127, %c0_128, %c0_129] : memref<2x7x16x16xf32, #tpu.memory_space<vmem>>, vector<1x1x16x16xf32>
    %135 = vector.shape_cast %134 : vector<1x1x16x16xf32> to vector<16x16xf32>
    %cst_130 = arith.constant dense<0.000000e+00> : vector<4x16xf32>
    %136 = tpu.matmul %6, %135, %cst_130 {dimension_numbers = #tpu.dot_dimension_numbers<[1], [0], [0], [1], [0, 0, 1, 1], [], []>} : vector<4x16xf32>, vector<16x16xf32>, vector<4x16xf32> -> vector<4x16xf32>
    %c1_131 = arith.constant 1 : index
    %c4_132 = arith.constant 4 : index
    %c0_133 = arith.constant 0 : index
    %c0_134 = arith.constant 0 : index
    %137 = vector.load %arg2[%c1_131, %c4_132, %c0_133, %c0_134] : memref<2x7x16x16xf32, #tpu.memory_space<vmem>>, vector<1x1x16x16xf32>
    %138 = vector.shape_cast %137 : vector<1x1x16x16xf32> to vector<16x16xf32>
    %cst_135 = arith.constant dense<0.000000e+00> : vector<4x16xf32>
    %139 = tpu.matmul %9, %138, %cst_135 {dimension_numbers = #tpu.dot_dimension_numbers<[1], [0], [0], [1], [0, 0, 1, 1], [], []>} : vector<4x16xf32>, vector<16x16xf32>, vector<4x16xf32> -> vector<4x16xf32>
    %140 = arith.addf %136, %139 : vector<4x16xf32>
    %cst_136 = arith.constant 0.000000e+00 : f32
    %141 = vector.broadcast %cst_136 : f32 to vector<1x16xf32>
    %142 = vector.extract_strided_slice %140 {offsets = [1, 0], sizes = [3, 16], strides = [1, 1]} : vector<4x16xf32> to vector<3x16xf32>
    %143 = tpu.concatenate %142, %141 in 0 : vector<3x16xf32>, vector<1x16xf32> -> vector<4x16xf32>
    %144 = arith.addf %133, %143 : vector<4x16xf32>
    %c0_137 = arith.constant 0 : index
    %c5_138 = arith.constant 5 : index
    %c0_139 = arith.constant 0 : index
    %c0_140 = arith.constant 0 : index
    %145 = vector.load %arg2[%c0_137, %c5_138, %c0_139, %c0_140] : memref<2x7x16x16xf32, #tpu.memory_space<vmem>>, vector<1x1x16x16xf32>
    %146 = vector.shape_cast %145 : vector<1x1x16x16xf32> to vector<16x16xf32>
    %cst_141 = arith.constant dense<0.000000e+00> : vector<4x16xf32>
    %147 = tpu.matmul %6, %146, %cst_141 {dimension_numbers = #tpu.dot_dimension_numbers<[1], [0], [0], [1], [0, 0, 1, 1], [], []>} : vector<4x16xf32>, vector<16x16xf32>, vector<4x16xf32> -> vector<4x16xf32>
    %c1_142 = arith.constant 1 : index
    %c5_143 = arith.constant 5 : index
    %c0_144 = arith.constant 0 : index
    %c0_145 = arith.constant 0 : index
    %148 = vector.load %arg2[%c1_142, %c5_143, %c0_144, %c0_145] : memref<2x7x16x16xf32, #tpu.memory_space<vmem>>, vector<1x1x16x16xf32>
    %149 = vector.shape_cast %148 : vector<1x1x16x16xf32> to vector<16x16xf32>
    %cst_146 = arith.constant dense<0.000000e+00> : vector<4x16xf32>
    %150 = tpu.matmul %9, %149, %cst_146 {dimension_numbers = #tpu.dot_dimension_numbers<[1], [0], [0], [1], [0, 0, 1, 1], [], []>} : vector<4x16xf32>, vector<16x16xf32>, vector<4x16xf32> -> vector<4x16xf32>
    %151 = arith.addf %147, %150 : vector<4x16xf32>
    %cst_147 = arith.constant 0.000000e+00 : f32
    %152 = vector.broadcast %cst_147 : f32 to vector<2x16xf32>
    %153 = vector.extract_strided_slice %151 {offsets = [2, 0], sizes = [2, 16], strides = [1, 1]} : vector<4x16xf32> to vector<2x16xf32>
    %154 = tpu.concatenate %153, %152 in 0 : vector<2x16xf32>, vector<2x16xf32> -> vector<4x16xf32>
    %155 = arith.addf %144, %154 : vector<4x16xf32>
    %c0_148 = arith.constant 0 : index
    %c6_149 = arith.constant 6 : index
    %c0_150 = arith.constant 0 : index
    %c0_151 = arith.constant 0 : index
    %156 = vector.load %arg2[%c0_148, %c6_149, %c0_150, %c0_151] : memref<2x7x16x16xf32, #tpu.memory_space<vmem>>, vector<1x1x16x16xf32>
    %157 = vector.shape_cast %156 : vector<1x1x16x16xf32> to vector<16x16xf32>
    %cst_152 = arith.constant dense<0.000000e+00> : vector<4x16xf32>
    %158 = tpu.matmul %6, %157, %cst_152 {dimension_numbers = #tpu.dot_dimension_numbers<[1], [0], [0], [1], [0, 0, 1, 1], [], []>} : vector<4x16xf32>, vector<16x16xf32>, vector<4x16xf32> -> vector<4x16xf32>
    %c1_153 = arith.constant 1 : index
    %c6_154 = arith.constant 6 : index
    %c0_155 = arith.constant 0 : index
    %c0_156 = arith.constant 0 : index
    %159 = vector.load %arg2[%c1_153, %c6_154, %c0_155, %c0_156] : memref<2x7x16x16xf32, #tpu.memory_space<vmem>>, vector<1x1x16x16xf32>
    %160 = vector.shape_cast %159 : vector<1x1x16x16xf32> to vector<16x16xf32>
    %cst_157 = arith.constant dense<0.000000e+00> : vector<4x16xf32>
    %161 = tpu.matmul %9, %160, %cst_157 {dimension_numbers = #tpu.dot_dimension_numbers<[1], [0], [0], [1], [0, 0, 1, 1], [], []>} : vector<4x16xf32>, vector<16x16xf32>, vector<4x16xf32> -> vector<4x16xf32>
    %162 = arith.addf %158, %161 : vector<4x16xf32>
    %cst_158 = arith.constant 0.000000e+00 : f32
    %163 = vector.broadcast %cst_158 : f32 to vector<3x16xf32>
    %164 = vector.extract_strided_slice %162 {offsets = [3, 0], sizes = [1, 16], strides = [1, 1]} : vector<4x16xf32> to vector<1x16xf32>
    %165 = tpu.concatenate %164, %163 in 0 : vector<1x16xf32>, vector<3x16xf32> -> vector<4x16xf32>
    %166 = arith.addf %155, %165 : vector<4x16xf32>
    %cst_159 = arith.constant 0.000000e+00 : f32
    %167 = vector.broadcast %cst_159 : f32 to vector<4x16xf32>
    %168 = arith.addf %166, %167 : vector<4x16xf32>
    %169 = arith.negf %168 : vector<4x16xf32>
    %170 = math.exp %169 : vector<4x16xf32>
    %cst_160 = arith.constant 1.000000e+00 : f32
    %171 = vector.broadcast %cst_160 : f32 to vector<4x16xf32>
    %172 = arith.addf %171, %170 : vector<4x16xf32>
    %173 = arith.divf %171, %172 : vector<4x16xf32>
    %c0_161 = arith.constant 0 : index
    %c0_162 = arith.constant 0 : index
    %c0_163 = arith.constant 0 : index
    %c0_164 = arith.constant 0 : index
    %174 = vector.load %arg3[%c0_161, %c0_162, %c0_163, %c0_164] : memref<2x7x16x16xf32, #tpu.memory_space<vmem>>, vector<1x1x16x16xf32>
    %175 = vector.shape_cast %174 : vector<1x1x16x16xf32> to vector<16x16xf32>
    %cst_165 = arith.constant dense<0.000000e+00> : vector<4x16xf32>
    %176 = tpu.matmul %10, %175, %cst_165 {dimension_numbers = #tpu.dot_dimension_numbers<[1], [0], [0], [1], [0, 0, 1, 1], [], []>} : vector<4x16xf32>, vector<16x16xf32>, vector<4x16xf32> -> vector<4x16xf32>
    %c1_166 = arith.constant 1 : index
    %c0_167 = arith.constant 0 : index
    %c0_168 = arith.constant 0 : index
    %c0_169 = arith.constant 0 : index
    %177 = vector.load %arg3[%c1_166, %c0_167, %c0_168, %c0_169] : memref<2x7x16x16xf32, #tpu.memory_space<vmem>>, vector<1x1x16x16xf32>
    %178 = vector.shape_cast %177 : vector<1x1x16x16xf32> to vector<16x16xf32>
    %cst_170 = arith.constant dense<0.000000e+00> : vector<4x16xf32>
    %179 = tpu.matmul %13, %178, %cst_170 {dimension_numbers = #tpu.dot_dimension_numbers<[1], [0], [0], [1], [0, 0, 1, 1], [], []>} : vector<4x16xf32>, vector<16x16xf32>, vector<4x16xf32> -> vector<4x16xf32>
    %180 = arith.addf %176, %179 : vector<4x16xf32>
    %cst_171 = arith.constant 0.000000e+00 : f32
    %181 = vector.broadcast %cst_171 : f32 to vector<3x16xf32>
    %182 = vector.extract_strided_slice %180 {offsets = [0, 0], sizes = [1, 16], strides = [1, 1]} : vector<4x16xf32> to vector<1x16xf32>
    %183 = tpu.concatenate %181, %182 in 0 : vector<3x16xf32>, vector<1x16xf32> -> vector<4x16xf32>
    %c0_172 = arith.constant 0 : index
    %c1_173 = arith.constant 1 : index
    %c0_174 = arith.constant 0 : index
    %c0_175 = arith.constant 0 : index
    %184 = vector.load %arg3[%c0_172, %c1_173, %c0_174, %c0_175] : memref<2x7x16x16xf32, #tpu.memory_space<vmem>>, vector<1x1x16x16xf32>
    %185 = vector.shape_cast %184 : vector<1x1x16x16xf32> to vector<16x16xf32>
    %cst_176 = arith.constant dense<0.000000e+00> : vector<4x16xf32>
    %186 = tpu.matmul %10, %185, %cst_176 {dimension_numbers = #tpu.dot_dimension_numbers<[1], [0], [0], [1], [0, 0, 1, 1], [], []>} : vector<4x16xf32>, vector<16x16xf32>, vector<4x16xf32> -> vector<4x16xf32>
    %c1_177 = arith.constant 1 : index
    %c1_178 = arith.constant 1 : index
    %c0_179 = arith.constant 0 : index
    %c0_180 = arith.constant 0 : index
    %187 = vector.load %arg3[%c1_177, %c1_178, %c0_179, %c0_180] : memref<2x7x16x16xf32, #tpu.memory_space<vmem>>, vector<1x1x16x16xf32>
    %188 = vector.shape_cast %187 : vector<1x1x16x16xf32> to vector<16x16xf32>
    %cst_181 = arith.constant dense<0.000000e+00> : vector<4x16xf32>
    %189 = tpu.matmul %13, %188, %cst_181 {dimension_numbers = #tpu.dot_dimension_numbers<[1], [0], [0], [1], [0, 0, 1, 1], [], []>} : vector<4x16xf32>, vector<16x16xf32>, vector<4x16xf32> -> vector<4x16xf32>
    %190 = arith.addf %186, %189 : vector<4x16xf32>
    %cst_182 = arith.constant 0.000000e+00 : f32
    %191 = vector.broadcast %cst_182 : f32 to vector<2x16xf32>
    %192 = vector.extract_strided_slice %190 {offsets = [0, 0], sizes = [2, 16], strides = [1, 1]} : vector<4x16xf32> to vector<2x16xf32>
    %193 = tpu.concatenate %191, %192 in 0 : vector<2x16xf32>, vector<2x16xf32> -> vector<4x16xf32>
    %194 = arith.addf %183, %193 : vector<4x16xf32>
    %c0_183 = arith.constant 0 : index
    %c2_184 = arith.constant 2 : index
    %c0_185 = arith.constant 0 : index
    %c0_186 = arith.constant 0 : index
    %195 = vector.load %arg3[%c0_183, %c2_184, %c0_185, %c0_186] : memref<2x7x16x16xf32, #tpu.memory_space<vmem>>, vector<1x1x16x16xf32>
    %196 = vector.shape_cast %195 : vector<1x1x16x16xf32> to vector<16x16xf32>
    %cst_187 = arith.constant dense<0.000000e+00> : vector<4x16xf32>
    %197 = tpu.matmul %10, %196, %cst_187 {dimension_numbers = #tpu.dot_dimension_numbers<[1], [0], [0], [1], [0, 0, 1, 1], [], []>} : vector<4x16xf32>, vector<16x16xf32>, vector<4x16xf32> -> vector<4x16xf32>
    %c1_188 = arith.constant 1 : index
    %c2_189 = arith.constant 2 : index
    %c0_190 = arith.constant 0 : index
    %c0_191 = arith.constant 0 : index
    %198 = vector.load %arg3[%c1_188, %c2_189, %c0_190, %c0_191] : memref<2x7x16x16xf32, #tpu.memory_space<vmem>>, vector<1x1x16x16xf32>
    %199 = vector.shape_cast %198 : vector<1x1x16x16xf32> to vector<16x16xf32>
    %cst_192 = arith.constant dense<0.000000e+00> : vector<4x16xf32>
    %200 = tpu.matmul %13, %199, %cst_192 {dimension_numbers = #tpu.dot_dimension_numbers<[1], [0], [0], [1], [0, 0, 1, 1], [], []>} : vector<4x16xf32>, vector<16x16xf32>, vector<4x16xf32> -> vector<4x16xf32>
    %201 = arith.addf %197, %200 : vector<4x16xf32>
    %cst_193 = arith.constant 0.000000e+00 : f32
    %202 = vector.broadcast %cst_193 : f32 to vector<1x16xf32>
    %203 = vector.extract_strided_slice %201 {offsets = [0, 0], sizes = [3, 16], strides = [1, 1]} : vector<4x16xf32> to vector<3x16xf32>
    %204 = tpu.concatenate %202, %203 in 0 : vector<1x16xf32>, vector<3x16xf32> -> vector<4x16xf32>
    %205 = arith.addf %194, %204 : vector<4x16xf32>
    %c0_194 = arith.constant 0 : index
    %c3_195 = arith.constant 3 : index
    %c0_196 = arith.constant 0 : index
    %c0_197 = arith.constant 0 : index
    %206 = vector.load %arg3[%c0_194, %c3_195, %c0_196, %c0_197] : memref<2x7x16x16xf32, #tpu.memory_space<vmem>>, vector<1x1x16x16xf32>
    %207 = vector.shape_cast %206 : vector<1x1x16x16xf32> to vector<16x16xf32>
    %cst_198 = arith.constant dense<0.000000e+00> : vector<4x16xf32>
    %208 = tpu.matmul %10, %207, %cst_198 {dimension_numbers = #tpu.dot_dimension_numbers<[1], [0], [0], [1], [0, 0, 1, 1], [], []>} : vector<4x16xf32>, vector<16x16xf32>, vector<4x16xf32> -> vector<4x16xf32>
    %c1_199 = arith.constant 1 : index
    %c3_200 = arith.constant 3 : index
    %c0_201 = arith.constant 0 : index
    %c0_202 = arith.constant 0 : index
    %209 = vector.load %arg3[%c1_199, %c3_200, %c0_201, %c0_202] : memref<2x7x16x16xf32, #tpu.memory_space<vmem>>, vector<1x1x16x16xf32>
    %210 = vector.shape_cast %209 : vector<1x1x16x16xf32> to vector<16x16xf32>
    %cst_203 = arith.constant dense<0.000000e+00> : vector<4x16xf32>
    %211 = tpu.matmul %13, %210, %cst_203 {dimension_numbers = #tpu.dot_dimension_numbers<[1], [0], [0], [1], [0, 0, 1, 1], [], []>} : vector<4x16xf32>, vector<16x16xf32>, vector<4x16xf32> -> vector<4x16xf32>
    %212 = arith.addf %208, %211 : vector<4x16xf32>
    %213 = arith.addf %205, %212 : vector<4x16xf32>
    %c0_204 = arith.constant 0 : index
    %c4_205 = arith.constant 4 : index
    %c0_206 = arith.constant 0 : index
    %c0_207 = arith.constant 0 : index
    %214 = vector.load %arg3[%c0_204, %c4_205, %c0_206, %c0_207] : memref<2x7x16x16xf32, #tpu.memory_space<vmem>>, vector<1x1x16x16xf32>
    %215 = vector.shape_cast %214 : vector<1x1x16x16xf32> to vector<16x16xf32>
    %cst_208 = arith.constant dense<0.000000e+00> : vector<4x16xf32>
    %216 = tpu.matmul %10, %215, %cst_208 {dimension_numbers = #tpu.dot_dimension_numbers<[1], [0], [0], [1], [0, 0, 1, 1], [], []>} : vector<4x16xf32>, vector<16x16xf32>, vector<4x16xf32> -> vector<4x16xf32>
    %c1_209 = arith.constant 1 : index
    %c4_210 = arith.constant 4 : index
    %c0_211 = arith.constant 0 : index
    %c0_212 = arith.constant 0 : index
    %217 = vector.load %arg3[%c1_209, %c4_210, %c0_211, %c0_212] : memref<2x7x16x16xf32, #tpu.memory_space<vmem>>, vector<1x1x16x16xf32>
    %218 = vector.shape_cast %217 : vector<1x1x16x16xf32> to vector<16x16xf32>
    %cst_213 = arith.constant dense<0.000000e+00> : vector<4x16xf32>
    %219 = tpu.matmul %13, %218, %cst_213 {dimension_numbers = #tpu.dot_dimension_numbers<[1], [0], [0], [1], [0, 0, 1, 1], [], []>} : vector<4x16xf32>, vector<16x16xf32>, vector<4x16xf32> -> vector<4x16xf32>
    %220 = arith.addf %216, %219 : vector<4x16xf32>
    %cst_214 = arith.constant 0.000000e+00 : f32
    %221 = vector.broadcast %cst_214 : f32 to vector<1x16xf32>
    %222 = vector.extract_strided_slice %220 {offsets = [1, 0], sizes = [3, 16], strides = [1, 1]} : vector<4x16xf32> to vector<3x16xf32>
    %223 = tpu.concatenate %222, %221 in 0 : vector<3x16xf32>, vector<1x16xf32> -> vector<4x16xf32>
    %224 = arith.addf %213, %223 : vector<4x16xf32>
    %c0_215 = arith.constant 0 : index
    %c5_216 = arith.constant 5 : index
    %c0_217 = arith.constant 0 : index
    %c0_218 = arith.constant 0 : index
    %225 = vector.load %arg3[%c0_215, %c5_216, %c0_217, %c0_218] : memref<2x7x16x16xf32, #tpu.memory_space<vmem>>, vector<1x1x16x16xf32>
    %226 = vector.shape_cast %225 : vector<1x1x16x16xf32> to vector<16x16xf32>
    %cst_219 = arith.constant dense<0.000000e+00> : vector<4x16xf32>
    %227 = tpu.matmul %10, %226, %cst_219 {dimension_numbers = #tpu.dot_dimension_numbers<[1], [0], [0], [1], [0, 0, 1, 1], [], []>} : vector<4x16xf32>, vector<16x16xf32>, vector<4x16xf32> -> vector<4x16xf32>
    %c1_220 = arith.constant 1 : index
    %c5_221 = arith.constant 5 : index
    %c0_222 = arith.constant 0 : index
    %c0_223 = arith.constant 0 : index
    %228 = vector.load %arg3[%c1_220, %c5_221, %c0_222, %c0_223] : memref<2x7x16x16xf32, #tpu.memory_space<vmem>>, vector<1x1x16x16xf32>
    %229 = vector.shape_cast %228 : vector<1x1x16x16xf32> to vector<16x16xf32>
    %cst_224 = arith.constant dense<0.000000e+00> : vector<4x16xf32>
    %230 = tpu.matmul %13, %229, %cst_224 {dimension_numbers = #tpu.dot_dimension_numbers<[1], [0], [0], [1], [0, 0, 1, 1], [], []>} : vector<4x16xf32>, vector<16x16xf32>, vector<4x16xf32> -> vector<4x16xf32>
    %231 = arith.addf %227, %230 : vector<4x16xf32>
    %cst_225 = arith.constant 0.000000e+00 : f32
    %232 = vector.broadcast %cst_225 : f32 to vector<2x16xf32>
    %233 = vector.extract_strided_slice %231 {offsets = [2, 0], sizes = [2, 16], strides = [1, 1]} : vector<4x16xf32> to vector<2x16xf32>
    %234 = tpu.concatenate %233, %232 in 0 : vector<2x16xf32>, vector<2x16xf32> -> vector<4x16xf32>
    %235 = arith.addf %224, %234 : vector<4x16xf32>
    %c0_226 = arith.constant 0 : index
    %c6_227 = arith.constant 6 : index
    %c0_228 = arith.constant 0 : index
    %c0_229 = arith.constant 0 : index
    %236 = vector.load %arg3[%c0_226, %c6_227, %c0_228, %c0_229] : memref<2x7x16x16xf32, #tpu.memory_space<vmem>>, vector<1x1x16x16xf32>
    %237 = vector.shape_cast %236 : vector<1x1x16x16xf32> to vector<16x16xf32>
    %cst_230 = arith.constant dense<0.000000e+00> : vector<4x16xf32>
    %238 = tpu.matmul %10, %237, %cst_230 {dimension_numbers = #tpu.dot_dimension_numbers<[1], [0], [0], [1], [0, 0, 1, 1], [], []>} : vector<4x16xf32>, vector<16x16xf32>, vector<4x16xf32> -> vector<4x16xf32>
    %c1_231 = arith.constant 1 : index
    %c6_232 = arith.constant 6 : index
    %c0_233 = arith.constant 0 : index
    %c0_234 = arith.constant 0 : index
    %239 = vector.load %arg3[%c1_231, %c6_232, %c0_233, %c0_234] : memref<2x7x16x16xf32, #tpu.memory_space<vmem>>, vector<1x1x16x16xf32>
    %240 = vector.shape_cast %239 : vector<1x1x16x16xf32> to vector<16x16xf32>
    %cst_235 = arith.constant dense<0.000000e+00> : vector<4x16xf32>
    %241 = tpu.matmul %13, %240, %cst_235 {dimension_numbers = #tpu.dot_dimension_numbers<[1], [0], [0], [1], [0, 0, 1, 1], [], []>} : vector<4x16xf32>, vector<16x16xf32>, vector<4x16xf32> -> vector<4x16xf32>
    %242 = arith.addf %238, %241 : vector<4x16xf32>
    %cst_236 = arith.constant 0.000000e+00 : f32
    %243 = vector.broadcast %cst_236 : f32 to vector<3x16xf32>
    %244 = vector.extract_strided_slice %242 {offsets = [3, 0], sizes = [1, 16], strides = [1, 1]} : vector<4x16xf32> to vector<1x16xf32>
    %245 = tpu.concatenate %244, %243 in 0 : vector<1x16xf32>, vector<3x16xf32> -> vector<4x16xf32>
    %246 = arith.addf %235, %245 : vector<4x16xf32>
    %cst_237 = arith.constant 0.000000e+00 : f32
    %247 = vector.broadcast %cst_237 : f32 to vector<4x16xf32>
    %248 = arith.addf %246, %247 : vector<4x16xf32>
    %249 = arith.negf %248 : vector<4x16xf32>
    %250 = math.exp %249 : vector<4x16xf32>
    %cst_238 = arith.constant 1.000000e+00 : f32
    %251 = vector.broadcast %cst_238 : f32 to vector<4x16xf32>
    %252 = arith.addf %251, %250 : vector<4x16xf32>
    %253 = arith.divf %251, %252 : vector<4x16xf32>
    %254 = vector.shape_cast %93 : vector<16x16xf32> to vector<1x16x16xf32>
    %255 = vector.shape_cast %173 : vector<4x16xf32> to vector<4x1x16xf32>
    %256 = vector.broadcast %254 : vector<1x16x16xf32> to vector<4x16x16xf32>
    %257 = vector.broadcast %255 : vector<4x1x16xf32> to vector<4x16x16xf32>
    %258 = arith.addf %256, %257 : vector<4x16x16xf32>
    %259 = vector.shape_cast %253 : vector<4x16xf32> to vector<4x16x1xf32>
    %260 = vector.broadcast %259 : vector<4x16x1xf32> to vector<4x16x16xf32>
    %261 = arith.addf %258, %260 : vector<4x16x16xf32>
    %cst_239 = arith.constant 0.333333343 : f32
    %262 = vector.broadcast %cst_239 : f32 to vector<4x16x16xf32>
    %263 = arith.mulf %261, %262 : vector<4x16x16xf32>
    %264 = arith.mulf %1, %263 : vector<4x16x16xf32>
    %c0_240 = arith.constant 0 : index
    %c0_241 = arith.constant 0 : index
    %c0_242 = arith.constant 0 : index
    %c0_243 = arith.constant 0 : index
    %265 = vector.load %arg5[%c0_240, %c0_241, %c0_242, %c0_243] : memref<1x4x16x16xf32, #tpu.memory_space<vmem>>, vector<1x4x16x16xf32>
    %266 = vector.shape_cast %265 : vector<1x4x16x16xf32> to vector<4x16x16xf32>
    %267 = vector.shape_cast %264 : vector<4x16x16xf32> to vector<1x4x16x16xf32>
    tpu.vector_store %arg5[%c0_240, %c0_241, %c0_242, %c0_243], %267 {strides = array<i32>} : memref<1x4x16x16xf32, #tpu.memory_space<vmem>>, vector<1x4x16x16xf32>,
    return
  }
  func.func @transform_0(%arg0: i32) -> (i32, i32, i32, i32) {
    %c0_i32 = arith.constant 0 : i32
    %c0_i32_0 = arith.constant 0 : i32
    %c0_i32_1 = arith.constant 0 : i32
    %c0_i32_2 = arith.constant 0 : i32
    return %arg0, %c0_i32, %c0_i32_0, %c0_i32_1 : i32, i32, i32, i32
  }
  func.func @transform_1(%arg0: i32) -> (i32, i32, i32, i32) {
    %c0_i32 = arith.constant 0 : i32
    %c0_i32_0 = arith.constant 0 : i32
    %c0_i32_1 = arith.constant 0 : i32
    %c0_i32_2 = arith.constant 0 : i32
    %c0_i32_3 = arith.constant 0 : i32
    return %c0_i32, %c0_i32_0, %c0_i32_1, %c0_i32_2 : i32, i32, i32, i32
  }
  func.func @transform_2(%arg0: i32) -> (i32, i32, i32, i32) {
    %c0_i32 = arith.constant 0 : i32
    %c0_i32_0 = arith.constant 0 : i32
    %c0_i32_1 = arith.constant 0 : i32
    %c0_i32_2 = arith.constant 0 : i32
    %c0_i32_3 = arith.constant 0 : i32
    return %c0_i32, %c0_i32_0, %c0_i32_1, %c0_i32_2 : i32, i32, i32, i32
  }
  func.func @transform_3(%arg0: i32) -> (i32, i32, i32, i32) {
    %c0_i32 = arith.constant 0 : i32
    %c0_i32_0 = arith.constant 0 : i32
    %c0_i32_1 = arith.constant 0 : i32
    %c0_i32_2 = arith.constant 0 : i32
    %c0_i32_3 = arith.constant 0 : i32
    return %c0_i32, %c0_i32_0, %c0_i32_1, %c0_i32_2 : i32, i32, i32, i32
  }
  func.func @transform_4(%arg0: i32) -> (i32, i32, i32, i32) {
    %c0_i32 = arith.constant 0 : i32
    %c0_i32_0 = arith.constant 0 : i32
    %c0_i32_1 = arith.constant 0 : i32
    %c0_i32_2 = arith.constant 0 : i32
    return %arg0, %c0_i32, %c0_i32_0, %c0_i32_1 : i32, i32, i32, i32
  }
}

</mosaic_0001>

<bundles_post_ra>
// kernel: triplet_attention.1
= control target key start
LH: loop header
LB: loop body
LE: loop exit
PB: predicated region body
PF: predicated region fallthrough
CT: control target
= control target key end

     0   :  { %9 = vsyncpa [#allocation3], 0  ;;  %s2821_s0 = inlined_call_operand.vmem [shape: f32[2,4,16,16], index: 0, kind: input, shape index: {}]   ;;  %s2822_s1 = inlined_call_operand.vmem [shape: f32[2,7,16,16], index: 1, kind: input, shape index: {}]   ;;  %s2823_s2 = inlined_call_operand.vmem [shape: f32[2,7,16,16], index: 2, kind: input, shape index: {}]   ;;  %s2824_s3 = inlined_call_operand.vmem [shape: f32[2,7,16,16], index: 3, kind: input, shape index: {}]   ;;  %s2825_s4 = inlined_call_operand.hbm [shape: f32[2,4,16,16], index: 4, kind: output, shape index: {}]  }
   0x1   :  { %11 = vsyncpa [#allocation3 + $0x1], 0  ;;  %s2149_s15 = smov 0   ;;  %s2151_s16 = smov 0  }
   0x2   :  { %s2153_s17 = smov 0   ;;  %s2155_s18 = smov 0  }
   0x3 LB: > { %s2170_s19 = sadd.s32 4294967295, %s2118_s18   ;;  %s1829_s20 = sadd.s32 4294967294, %s2118_s18   ;;  %s2118_s18 = sphi %s2155_s18, %s2835_s18   ;;  %s2114_s17 = sphi %s2153_s17, %s2834_s17   ;;  %s2110_s16 = sphi %s2151_s16, %s2833_s16   ;;  %s2106_s15 = sphi %s2149_s15, %s2832_s15  }
   0x4   : > { %s2174_s21 = sadd.s32 1, %s2118_s18   ;;  %s113_s22 = sadd.s32 1, %s2114_s17 }
   0x5   : > { %s110_s23 = ssub.s32 %s2118_s18, %s2174_s21  ;;  %p123_p0 = scmp.ne.s32.totalorder %s2114_s17, %s2110_s16 }
   0x6   : > { %p111_p1 = scmp.eq.s32.totalorder %s110_s23, 0  ;;  %p124_p2 = scmp.eq.s32.totalorder %s2170_s19, 1 }
   0x7   : > { %p129_p3 = scmp.ne.s32.totalorder %s2110_s16, %s2106_s15  ;;  %p130_p4 = scmp.eq.s32.totalorder %s1829_s20, 1 }
   0x8   : > { %s2185_s24 = scalar_select %p111_p1, %s2114_s17, %s113_s22  }
   0x9   : > { %p2187_p5 = por %p124_p2, %p123_p0  ;;  %p2191_p6 = por %p130_p4, %p129_p3 }
   0xa   : > { %p1832_p7 = scmp.ge.s32.totalorder %s2118_s18, 1  ;;  %p165_p8 = scmp.lt.s32.totalorder %s2118_s18, 3 }
   0xc   : > { %p166_p9 = pnand %p1832_p7, %p165_p8 }
   0xd   : > { %p191_p10 = scmp.lt.s32.totalorder (!%p166_p9), %s2170_s19, 1  ;;  %s188_s12 = sand.u32 (!%p166_p9), 1, %s2110_s16  }
   0xe   : > { %169 = sbr.rel (%p166_p9) target bundleno = 523 (0x20b), region = 36  ;;  %s1833_s14 = sshll.u32 (!%p166_p9), %s188_s12, 6 }
   0xf   : > { %s2755_s20 = scalar_lea.vmem (!%p166_p9), [#allocation2], %s1833_s14  ;;  %s1980_s22 = sshll.u32 (!%p166_p9), %s2170_s19, 6 }
  0x10   : > { %s1763_s28 = scalar_lea.hbm (!%p166_p9), %s2825_s4, %s1980_s22  ;;  %s1764_s29 = sshll.u32 (!%p166_p9), %s2755_s20, 4  ;;  %s1765_s29 = int_to_ptr.vmem [resolvable:$true] %s1764_s29 }
  0x11   : > { %s1766_s30 = sshll.u32 (!%p166_p9), %s1763_s28, 4  ;;  %s1767_s30 = int_to_ptr.hbm [resolvable:$true] %s1766_s30 }
  0x12   : > { %s2070_s5 = sshra.s32 (!%p166_p9), %s1767_s30, 4  ;;  %s2071_s5 = int_to_ptr.hbm [resolvable:$true] %s2070_s5 }
  0x13   : > { %v1837_v0 = vld [vmem:[%s2824_s3 + $0x78] sm:$0xff]  ;;  %v350_v1 = vld [vmem:[%s2824_s3 + $0x8] sm:$0xff]  ;;  %v2120_v3 = vmov 4.0   ;;  %v1836_v5 = vld [vmem:[%s2824_s3 + $0x70] sm:$0xff]  ;;  %s192_s13 = scalar_select %p191_p10, %s2170_s19, 1  ;;  %vm204_vm0 = vcmask 130048  }
  0x14   : > { %v1845_v2 = vld [vmem:[%s2824_s3 + $0x88] sm:$0xff]  ;;  %2028 = vrcp.f32 %v2120_v3  ;;  %374 = vmatpush.msra.mxu0 %v1837_v0  ;;  %403 = vmatpush.msra.mxu1 %v350_v1  ;;  %v1843_v4 = vld [vmem:[%s2824_s3 + $0x18] sm:$0xff]  ;;  %v349_v6 = vld [vmem:[%s2824_s3] sm:$0xff]  ;;  %vm839_vm3 = vcmask 1041409   ;;  %vm841_vm4 = vcmask 1042434   ;;  %vm843_vm5 = vcmask 1043459   ;;  %p2077_p0 = scmp.lt.s32.totalorder %s2071_s5, %s2825_s4 }
  0x15   : > { %441 = vmatpush.msra.mxu2 %v1845_v2  ;;  %464 = vmatpush.msra.mxu3 %v1843_v4  ;;  %v1844_v7 = vld [vmem:[%s2824_s3 + $0x80] sm:$0xff]  ;;  %v1842_v8 = vld [vmem:[%s2824_s3 + $0x10] sm:$0xff]  ;;  %v1853_v9 = vld [vmem:[%s2824_s3 + $0x98] sm:$0xff]  ;;  %s1979_s9 = sshll.u32 %s192_s13, 6  ;;  %v2121_v4 = vmov 16.0   ;;  %vm1240_vm6 = vcmask 130112  }
  0x16   : > { %375 = vmatpush.msra.mxu0 %v1836_v5  ;;  %404 = vmatpush.msra.mxu1 %v349_v6  ;;  %v1851_v10 = vld [vmem:[%s2824_s3 + $0x28] sm:$0xff]  ;;  %v1859_v12 = vld [vmem:[%s2824_s3 + $0x38] sm:$0xff]  ;;  %v1852_v13 = vld [vmem:[%s2824_s3 + $0x90] sm:$0xff]  ;;  %s2244_s23 = scalar_lea.vmem %s2821_s0, %s1979_s9  ;;  %2030 = vrcp.f32 %v2121_v4  ;;  %vm414_vm7 = vcmask 1042432   ;;  %vm475_vm8 = vcmask 1041408   ;;  %vm538_vm9 = vcmask 1040384  }
  0x17   : > { %v1861_v11 = vld [vmem:[%s2824_s3 + $0xa8] sm:$0xff]  ;;  %442 = vmatpush.msra.mxu2 %v1844_v7  ;;  %465 = vmatpush.msra.mxu3 %v1842_v8  ;;  %v1850_v14 = vld [vmem:[%s2824_s3 + $0x20] sm:$0xff]  ;;  %v198_v17 = vld [vmem:[%s2244_s23 + $0x10] sm:$0xff]  ;;  %vm655_vm10 = vcmask 1046528   ;;  %vm718_vm11 = vcmask 1045504   ;;  %vm781_vm12 = vcmask 1044480  }
  0x18   : > { %504 = vmatpush.msrb.mxu0 %v1853_v9  ;;  %527 = vmatpush.msrb.mxu1 %v1851_v10  ;;  %v1860_v15 = vld [vmem:[%s2824_s3 + $0xa0] sm:$0xff]  ;;  %v202_v18 = vld [vmem:[%s2244_s23 + $0x30] sm:$0xff]  ;;  %v2262_v23 = vsel %vm204_vm0, %v198_v17, 0.0  ;;  %v2271_v26 = vsel %vm204_vm0, %v198_v17, -inf  ;;  %v201_v35 = vld [vmem:[%s2244_s23 + $0x28] sm:$0xff]  ;;  %s1752_s19 = scalar_lea.sflag [#allocation3], %s188_s12 }
  0x19   : > { %v200_v16 = vld [vmem:[%s2244_s23 + $0x20] sm:$0xff]  ;;  %567 = vmatpush.msrb.mxu2 %v1861_v11  ;;  %590 = vmatpush.msrb.mxu3 %v1859_v12  ;;  %v2259_v22 = vsel %vm204_vm0, %v202_v18, -inf  ;;  %v1858_v25 = vld [vmem:[%s2824_s3 + $0x30] sm:$0xff]  ;;  %v2285_v32 = vsel %vm204_vm0, %v202_v18, 0.0  ;;  %v199_v36 = vld [vmem:[%s2244_s23 + $0x18] sm:$0xff]  ;;  %v229_v42 = vsel %vm204_vm0, %v201_v35, 0.0 }
  0x1a   : > { %v2029_v19 = vpop.eup %2028  ;;  %v2253_v20 = vsel %vm204_vm0, %v200_v16, 0.0  ;;  %v2256_v21 = vsel %vm204_vm0, %v200_v16, -inf  ;;  %v196_v24 = vld [vmem:[%s2244_s23] sm:$0xff]  ;;  %505 = vmatpush.msrb.mxu0 %v1852_v13  ;;  %528 = vmatpush.msrb.mxu1 %v1850_v14  ;;  %v210_v29 = vmax.f32 %v2271_v26, %v2259_v22  ;;  %v197_v38 = vld [vmem:[%s2244_s23 + $0x8] sm:$0xff]  ;;  %v227_v43 = vsel %vm204_vm0, %v199_v36, 0.0  ;;  %v203_v45 = vld [vmem:[%s2244_s23 + $0x38] sm:$0xff] }
  0x1b   : > { %333 = vadd.xlane.f32.xlu2 %v2253_v20  ;;  %329 = vadd.xlane.f32.xlu1 %v2262_v23  ;;  %v2274_v27 = vsel %vm204_vm0, %v196_v24, 0.0  ;;  %v234_v28 = vmul.f32 4.0, %v2029_v19  ;;  %v2280_v30 = vsel %vm204_vm0, %v196_v24, -inf  ;;  %vm238_vm1 = vweird.f32 %v2029_v19  ;;  %v1867_v49 = vld [vmem:[%s2824_s3 + $0x48] sm:$0xff]  ;;  %v1875_v50 = vld [vmem:[%s2824_s3 + $0x58] sm:$0xff]  ;;  %v1866_v56 = vld [vmem:[%s2824_s3 + $0x40] sm:$0xff] }
  0x1c   : > { %325 = vadd.xlane.f32.xlu0 %v2274_v27  ;;  %v221_v31 = vadd.f32 %v2262_v23, %v2274_v27  ;;  %568 = vmatpush.msrb.mxu2 %v1860_v15  ;;  %v208_v34 = vmax.f32 %v2280_v30, %v2256_v21  ;;  %v226_v46 = vsel %vm204_vm0, %v197_v38, 0.0  ;;  %v231_v52 = vsel %vm204_vm0, %v203_v45, 0.0  ;;  %v1869_v53 = vld [vmem:[%s2824_s3 + $0xb8] sm:$0xff]  ;;  %v1877_v54 = vld [vmem:[%s2824_s3 + $0xc8] sm:$0xff]  ;;  %v1874_v57 = vld [vmem:[%s2824_s3 + $0x50] sm:$0xff]  ;;  %v2364_v13 = vpop.eup %2030  ;;  %s2072_s6 = scalar_lea.hbm %s2071_s5, 64 }
  0x1d   : > { %v235_v33 = vsub.f32 1.0, %v234_v28  ;;  %591 = vmatpush.msrb.mxu3 %v1858_v25  ;;  %v228_v47 = vadd.f32 %v227_v43, %v226_v46  ;;  %v213_v58 = vsel %vm204_vm0, %v199_v36, -inf  ;;  %v1868_v59 = vld [vmem:[%s2824_s3 + $0xb0] sm:$0xff]  ;;  %v1876_v60 = vld [vmem:[%s2824_s3 + $0xc0] sm:$0xff]  ;;  %v2337_v62 = vsel %vm204_vm0, %v203_v45, -inf  ;;  %v1897_v4 = vld [vmem:[%s2822_s1 + $0x18] sm:$0xff]  ;;  %p2073_p11 = scmp.ne.s32.totalorder %s2071_s5, %s2072_s6 }
  0x1e   : > { %v223_v37 = vadd.f32 %v2253_v20, %v221_v31  ;;  %v2293_v40 = vmax.f32 %v208_v34, %v210_v29  ;;  %v212_v63 = vsel %vm204_vm0, %v197_v38, -inf  ;;  %v2341_v0 = vsel %vm204_vm0, %v201_v35, -inf  ;;  %v1884_v29 = vld [vmem:[%s2824_s3 + $0xd0] sm:$0xff]  ;;  %s2076_s9 = scalar_lea.hbm %s2825_s4, 128 }
  0x1f   : > { %v236_v39 = vmul.f32 %v2029_v19, %v235_v33  ;;  %v230_v55 = vadd.f32 %v229_v42, %v228_v47  ;;  %v217_v1 = vmax.f32 %v213_v58, %v2337_v62  ;;  %v215_v3 = vmax.f32 %v212_v63, %v2341_v0  ;;  %v1892_v36 = vld [vmem:[%s2822_s1 + $0x70] sm:$0xff]  ;;  %p2074_p12 = pnand %p2073_p11, %p2187_p5  ;;  %p2078_p1 = scmp.lt.s32.totalorder %s2076_s9, %s2072_s6 }
  0x20   : > { %v225_v41 = vadd.f32 %v2285_v32, %v223_v37  ;;  %1840 = vmatmul.msk.f32.vlgmr.msra.gmra.mxu1 %vm204_vm0, %v2293_v40  ;;  %1848 = vmatmul.msk.f32.vlgmr.msra.gmra.mxu3 %vm204_vm0, %v2293_v40  ;;  %v277_v5 = vadd.f32 %v227_v43, %v2262_v23  ;;  %v270_v6 = vadd.f32 %v226_v46, %v2274_v27  ;;  %v299_v23 = vmul.f32 16.0, %v2364_v13  ;;  %v831_v27 = vld [vmem:[%s2822_s1 + $0x8] sm:$0xff] }
  0x21   : > { %v237_v44 = vadd.f32 %v2029_v19, %v236_v39  ;;  %644 = vmatpush.msra.mxu1 %v1867_v49  ;;  %707 = vmatpush.msra.mxu3 %v1875_v50  ;;  %v232_v61 = vadd.f32 %v231_v52, %v230_v55  ;;  %v2351_v7 = vmax.f32 %v215_v3, %v217_v1  ;;  %vm303_vm2 = vweird.f32 %v2364_v13  ;;  %v1899_v3 = vld [vmem:[%s2822_s1 + $0x88] sm:$0xff]  ;;  %p2075_p13 = pneg %p2074_p12  ;;  %p2079_p2 = por %p2078_p1, %p2077_p0 }
  0x22   : > { %v284_v8 = vadd.f32 %v229_v42, %v2253_v20  ;;  %v278_v9 = vrot.slane %v277_v5, 4  ;;  %v271_v10 = vrot.slane %v270_v6, 4  ;;  %v249_v11 = vmax.f32 %v2271_v26, %v213_v58  ;;  %v1883_v20 = vld [vmem:[%s2824_s3 + $0x68] sm:$0xff] }
  0x23   : > { %v239_v48 = vsel %vm238_vm1, %v2029_v19, %v237_v44  ;;  %335 = vadd.xlane.f32.xlu2 %v229_v42  ;;  %331 = vadd.xlane.f32.xlu1 %v227_v43  ;;  %v242_v12 = vmax.f32 %v2280_v30, %v212_v63  ;;  %v291_v14 = vadd.f32 %v231_v52, %v2285_v32  ;;  %v1885_v19 = vld [vmem:[%s2824_s3 + $0xd8] sm:$0xff]  ;;  %v300_v37 = vsub.f32 1.0, %v299_v23  ;;  %p2080_p3 = pnand %p2079_p2, %p2075_p13 }
  0x24   : > { %v2310_v51 = vmul.f32 %v239_v48, %v225_v41  ;;  %327 = vadd.xlane.f32.xlu0 %v226_v46  ;;  %645 = vmatpush.msra.mxu1 %v1866_v56  ;;  %v2344_v2 = vmul.f32 %v239_v48, %v232_v61  ;;  %v285_v15 = vrot.slane %v284_v8, 4  ;;  %v279_v16 = vadd.f32 %v278_v9, %v277_v5  ;;  %v830_v41 = vld [vmem:[%s2822_s1] sm:$0xff]  ;;  %v1903_v9 = vld [vmem:[%s2822_s1 + $0x28] sm:$0xff] }
  0x25   : > { %708 = vmatpush.msra.mxu3 %v1874_v57  ;;  %v272_v17 = vadd.f32 %v271_v10, %v270_v6  ;;  %v256_v18 = vmax.f32 %v2256_v21, %v2341_v0  ;;  %v250_v24 = vrot.slane %v249_v11, 4  ;;  %v243_v25 = vrot.slane %v242_v12, 4 }
  0x26   : > { %1838 = vmatmul.msk.f32.vlgmr.msra.gmra.mxu0 %vm204_vm0, %v2310_v51  ;;  %1846 = vmatmul.msk.f32.vlgmr.msra.gmra.mxu2 %vm204_vm0, %v2310_v51  ;;  %v292_v28 = vrot.slane %v291_v14, 4  ;;  %v286_v31 = vadd.f32 %v285_v15, %v284_v8  ;;  %v280_v33 = vrot.slane %v279_v16, 2  ;;  %v301_v48 = vmul.f32 %v2364_v13, %v300_v37  ;;  %v1904_v15 = vld [vmem:[%s2822_s1 + $0x90] sm:$0xff]  ;;  %v1909_v37 = vld [vmem:[%s2822_s1 + $0x38] sm:$0xff] }
  0x27   : > { %621 = vmatpush.msra.mxu0 %v1869_v53  ;;  %684 = vmatpush.msra.mxu2 %v1877_v54  ;;  %v273_v34 = vrot.slane %v272_v17, 2  ;;  %v257_v35 = vrot.slane %v256_v18, 4  ;;  %v251_v38 = vmax.f32 %v249_v11, %v250_v24  ;;  %v244_v39 = vmax.f32 %v242_v12, %v243_v25  ;;  %v1898_v11 = vld [vmem:[%s2822_s1 + $0x80] sm:$0xff]  ;;  %v1896_v12 = vld [vmem:[%s2822_s1 + $0x10] sm:$0xff] }
  0x28   : > { %1841 = vmatmul.msk.f32.gmra.mxu1 %vm204_vm0, %v2351_v7  ;;  %1849 = vmatmul.msk.f32.gmra.mxu3 %vm204_vm0, %v2351_v7  ;;  %v293_v42 = vadd.f32 %v292_v28, %v291_v14  ;;  %v287_v43 = vrot.slane %v286_v31, 2  ;;  %v281_v45 = vadd.f32 %v280_v33, %v279_v16  ;;  %v302_v56 = vadd.f32 %v2364_v13, %v301_v48  ;;  %v1902_v16 = vld [vmem:[%s2822_s1 + $0x20] sm:$0xff] }
  0x29   : > { %622 = vmatpush.msra.mxu0 %v1868_v59  ;;  %685 = vmatpush.msra.mxu2 %v1876_v60  ;;  %v274_v46 = vadd.f32 %v273_v34, %v272_v17  ;;  %v258_v47 = vmax.f32 %v256_v18, %v257_v35  ;;  %v252_v49 = vrot.slane %v251_v38, 2  ;;  %v245_v50 = vrot.slane %v244_v39, 2  ;;  %v1926_v48 = vld [vmem:[%s2822_s1 + $0x60] sm:$0xff] }
  0x2a   : > { %v282_v53 = vrot.slane %v281_v45, 1  ;;  %v2427_v5 = vsel %vm303_vm2, %v2364_v13, %v302_v56  ;;  %v1952_v56 = vld [vmem:[%s2823_s2 + $0xa8] sm:$0xff] }
  0x2b   : > { %313 = vmax.xlane.f32.xlu2 %v2271_v26  ;;  %311 = vmax.xlane.f32.xlu1 %v212_v63  ;;  %v1893_v26 = vld [vmem:[%s2822_s1 + $0x78] sm:$0xff]  ;;  %v275_v54 = vrot.slane %v274_v46, 1  ;;  %v259_v55 = vrot.slane %v258_v47, 2  ;;  %v253_v57 = vmax.f32 %v251_v38, %v252_v49 }
  0x2c   : > { %309 = vmax.xlane.f32.xlu0 %v2280_v30  ;;  %v1882_v30 = vld [vmem:[%s2824_s3 + $0x60] sm:$0xff]  ;;  %v283_v63 = vadd.f32 %v282_v53, %v281_v45  ;;  %v1917_v38 = vld [vmem:[%s2822_s1 + $0xb8] sm:$0xff] }
  0x2d   : > { %v260_v1 = vmax.f32 %v258_v47, %v259_v55  ;;  %v254_v6 = vrot.slane %v253_v57, 1  ;;  %v1922_v45 = vld [vmem:[%s2822_s1 + $0xc0] sm:$0xff]  ;;  %v1928_v47 = vld [vmem:[%s2822_s1 + $0xd0] sm:$0xff]  ;;  %v1934_v49 = vld [vmem:[%s2823_s2 + $0x78] sm:$0xff] }
  0x2e   : > { %1839 = vmatmul.msk.f32.gmra.mxu0 %vm204_vm0, %v2344_v2  ;;  %1847 = vmatmul.msk.f32.gmra.mxu2 %vm204_vm0, %v2344_v2  ;;  %v306_v17 = vmul.f32 %v2427_v5, %v283_v63  ;;  %v1946_v55 = vld [vmem:[%s2823_s2 + $0x98] sm:$0xff] }
  0x30   : > { %1856 = vmatmul.msk.f32.vlgmr.msrb.gmra.mxu1 %vm204_vm0, %v2293_v40  ;;  %1864 = vmatmul.msk.f32.vlgmr.msrb.gmra.mxu3 %vm204_vm0, %v2293_v40 }
  0x31   : > { %770 = vmatpush.msrb.mxu1 %v1883_v20  ;;  %890 = vmatpush.msrb.mxu3 %v831_v27  ;;  %v255_v20 = vmax.f32 %v253_v57, %v254_v6  ;;  %v1945_v57 = vld [vmem:[%s2823_s2 + $0x90] sm:$0xff] }
  0x33   : > { %339 = vadd.xlane.f32.xlu2 %v231_v52  ;;  %337 = vadd.xlane.f32.xlu1 %v2285_v32  ;;  %v263_v32 = vmax.f32 %v2259_v22, %v2337_v62 }
  0x34   : > { %315 = vmax.xlane.f32.xlu0 %v213_v58  ;;  %771 = vmatpush.msrb.mxu1 %v1882_v30  ;;  %v246_v58 = vmax.f32 %v244_v39, %v245_v50  ;;  %v1915_v39 = vld [vmem:[%s2822_s1 + $0x48] sm:$0xff] }
  0x35   : > { %v264_v44 = vrot.slane %v263_v32, 4  ;;  %891 = vmatpush.msrb.mxu3 %v830_v41  ;;  %v1910_v41 = vld [vmem:[%s2822_s1 + $0xa0] sm:$0xff]  ;;  %v1940_v50 = vld [vmem:[%s2823_s2 + $0x88] sm:$0xff] }
  0x36   : > { %1854 = vmatmul.msk.f32.vlgmr.msrb.gmra.mxu0 %vm204_vm0, %v2310_v51  ;;  %1862 = vmatmul.msk.f32.vlgmr.msrb.gmra.mxu2 %vm204_vm0, %v2310_v51  ;;  %v247_v8 = vrot.slane %v246_v58, 1 }
  0x37   : > { %747 = vmatpush.msrb.mxu0 %v1885_v19  ;;  %861 = vmatpush.msrb.mxu2 %v1893_v26  ;;  %v265_v52 = vmax.f32 %v263_v32, %v264_v44  ;;  %v261_v19 = vrot.slane %v260_v1, 1  ;;  %v1921_v44 = vld [vmem:[%s2822_s1 + $0x58] sm:$0xff] }
  0x38   : > { %1857 = vmatmul.msk.f32.gmra.mxu1 %vm204_vm0, %v2351_v7  ;;  %1865 = vmatmul.msk.f32.gmra.mxu3 %vm204_vm0, %v2351_v7  ;;  %v248_v23 = vmax.f32 %v246_v58, %v247_v8  ;;  %v1951_v58 = vld [vmem:[%s2823_s2 + $0xa0] sm:$0xff] }
  0x39   : > { %748 = vmatpush.msrb.mxu0 %v1884_v29  ;;  %862 = vmatpush.msrb.mxu2 %v1892_v36  ;;  %v266_v61 = vrot.slane %v265_v52, 2  ;;  %v262_v27 = vmax.f32 %v260_v1, %v261_v19  ;;  %v1911_v36 = vld [vmem:[%s2822_s1 + $0xa8] sm:$0xff]  ;;  %v1938_v1 = vld [vmem:[%s2823_s2 + $0x18] sm:$0xff] }
  0x3a   : > { %v871_v29 = vsel %vm839_vm3, %v255_v20, %v248_v23 }
  0x3b   : > { %319 = vmax.xlane.f32.xlu1 %v2341_v0  ;;  %321 = vmax.xlane.f32.xlu2 %v2259_v22  ;;  %v294_v22 = vrot.slane %v293_v42, 2  ;;  %v276_v0 = vadd.f32 %v275_v54, %v274_v46  ;;  %v267_v14 = vmax.f32 %v265_v52, %v266_v61  ;;  %v872_v33 = vsel %vm841_vm4, %v262_v27, %v871_v29  ;;  %v1920_v46 = vld [vmem:[%s2822_s1 + $0x50] sm:$0xff] }
  0x3c   : > { %317 = vmax.xlane.f32.xlu0 %v2256_v21  ;;  %v288_v21 = vadd.f32 %v287_v43, %v286_v31  ;;  %v1923_v43 = vld [vmem:[%s2822_s1 + $0xc8] sm:$0xff]  ;;  %v1235_v61 = vlaneseq }
  0x3d   : > { %v295_v59 = vadd.f32 %v294_v22, %v293_v42  ;;  %v305_v18 = vmul.f32 %v2427_v5, %v276_v0  ;;  %v268_v26 = vrot.slane %v267_v14, 1  ;;  %v1916_v42 = vld [vmem:[%s2822_s1 + $0xb0] sm:$0xff]  ;;  %v1223_v0 = vld [vmem:[%s2823_s2 + $0x8] sm:$0xff] }
  0x3e   : > { %1855 = vmatmul.msk.f32.gmra.mxu0 %vm204_vm0, %v2344_v2  ;;  %1863 = vmatmul.msk.f32.gmra.mxu2 %vm204_vm0, %v2344_v2  ;;  %v289_v60 = vrot.slane %v288_v21, 1  ;;  %v1933_v22 = vld [vmem:[%s2823_s2 + $0x70] sm:$0xff]  ;;  %v2580_v6 = vand.u32 127, %v1235_v61 }
  0x3f   : > { %v296_v10 = vrot.slane %v295_v59, 1  ;;  %v840_v28 = vsel %vm839_vm3, %v306_v17, %v305_v18  ;;  %v269_v32 = vmax.f32 %v267_v14, %v268_v26  ;;  %v1950_v17 = vld [vmem:[%s2823_s2 + $0x38] sm:$0xff]  ;;  %v1949_v26 = vld [vmem:[%s2823_s2 + $0x30] sm:$0xff] }
  0x40   : > { %1872 = vmatmul.msk.f32.vlgmr.msra.gmra.mxu1 %vm204_vm0, %v2293_v40  ;;  %1880 = vmatmul.msk.f32.vlgmr.msra.gmra.mxu3 %vm204_vm0, %v2293_v40  ;;  %v290_v13 = vadd.f32 %v289_v60, %v288_v21  ;;  %v1939_v21 = vld [vmem:[%s2823_s2 + $0x80] sm:$0xff] }
  0x41   : > { %940 = vmatpush.msra.mxu3 %v1897_v4  ;;  %991 = vmatpush.msra.mxu1 %v1903_v9  ;;  %v297_v24 = vadd.f32 %v296_v10, %v295_v59  ;;  %v873_v35 = vsel %vm843_vm5, %v269_v32, %v872_v33  ;;  %v1937_v4 = vld [vmem:[%s2823_s2 + $0x10] sm:$0xff] }
  0x42   : > { %v307_v25 = vmul.f32 %v2427_v5, %v290_v13 }
  0x43   : > { %941 = vmatpush.msra.mxu3 %v1896_v12  ;;  %992 = vmatpush.msra.mxu1 %v1902_v16  ;;  %v308_v30 = vmul.f32 %v2427_v5, %v297_v24  ;;  %v1943_v16 = vld [vmem:[%s2823_s2 + $0x20] sm:$0xff] }
  0x44   : > { %323 = vmax.xlane.f32.xlu0 %v2337_v62  ;;  %v1905_v62 = vld [vmem:[%s2822_s1 + $0x98] sm:$0xff]  ;;  %v842_v31 = vsel %vm841_vm4, %v307_v25, %v840_v28 }
  0x45   : > { %v844_v34 = vsel %vm843_vm5, %v308_v30, %v842_v31 }
  0x46   : > { %1870 = vmatmul.msk.f32.vlgmr.msra.gmra.mxu0 %vm204_vm0, %v2310_v51  ;;  %1878 = vmatmul.msk.f32.vlgmr.msra.gmra.mxu2 %vm204_vm0, %v2310_v51 }
  0x47   : > { %920 = vmatpush.msra.mxu2 %v1899_v3  ;;  %971 = vmatpush.msra.mxu0 %v1905_v62  ;;  %v1222_v3 = vld [vmem:[%s2823_s2] sm:$0xff]  ;;  %v2584_v62 = vadd.s32 4294967288, %v2580_v6 }
  0x48   : > { %1873 = vmatmul.msk.f32.gmra.mxu1 %vm204_vm0, %v2351_v7  ;;  %1881 = vmatmul.msk.f32.gmra.mxu3 %vm204_vm0, %v2351_v7 }
  0x49   : > { %921 = vmatpush.msra.mxu2 %v1898_v11  ;;  %972 = vmatpush.msra.mxu0 %v1904_v15  ;;  %v1944_v15 = vld [vmem:[%s2823_s2 + $0x28] sm:$0xff] }
  0x4e   : > { %1871 = vmatmul.msk.f32.gmra.mxu0 %vm204_vm0, %v2344_v2  ;;  %1879 = vmatmul.msk.f32.gmra.mxu2 %vm204_vm0, %v2344_v2 }
  0x50   : > { %1888 = vmatmul.msk.f32.vlgmr.msrb.gmra.mxu1 %vm204_vm0, %v2293_v40  ;;  %1895 = vmatmul.msk.f32.vlgmr.msrb.gmra.mxu3 %vm204_vm0, %v873_v35  ;;  %v1914_v40 = vld [vmem:[%s2822_s1 + $0x40] sm:$0xff] }
  0x51   : > { %1042 = vmatpush.msrb.mxu3 %v1909_v37  ;;  %1089 = vmatpush.msrb.mxu1 %v1915_v39 }
  0x53   : > { %1090 = vmatpush.msrb.mxu1 %v1914_v40 }
  0x56   : > { %1886 = vmatmul.msk.f32.vlgmr.msrb.gmra.mxu0 %vm204_vm0, %v2310_v51  ;;  %1894 = vmatmul.msk.f32.vlgmr.msrb.gmra.mxu2 %vm204_vm0, %v844_v34  ;;  %v1908_v51 = vld [vmem:[%s2822_s1 + $0x30] sm:$0xff] }
  0x57   : > { %1022 = vmatpush.msrb.mxu2 %v1911_v36  ;;  %1069 = vmatpush.msrb.mxu0 %v1917_v38 }
  0x58   : > { %1043 = vmatpush.msrb.mxu3 %v1908_v51  ;;  %1889 = vmatmul.msk.f32.gmra.mxu1 %vm204_vm0, %v2351_v7  ;;  %v1927_v7 = vld [vmem:[%s2822_s1 + $0x68] sm:$0xff] }
  0x59   : > { %1023 = vmatpush.msrb.mxu2 %v1910_v41  ;;  %1070 = vmatpush.msrb.mxu0 %v1916_v42 }
  0x5a   : > { %1901 = vmatmul.msk.f32.vlgmr.msra.gmra.mxu3 %vm204_vm0, %v873_v35 }
  0x5b   : > { %1140 = vmatpush.msra.mxu3 %v1921_v44 }
  0x5d   : > { %1141 = vmatpush.msra.mxu3 %v1920_v46 }
  0x5e   : > { %1887 = vmatmul.msk.f32.gmra.mxu0 %vm204_vm0, %v2344_v2  ;;  %1900 = vmatmul.msk.f32.vlgmr.msra.gmra.mxu2 %vm204_vm0, %v844_v34  ;;  %v1929_v2 = vld [vmem:[%s2822_s1 + $0xd8] sm:$0xff] }
  0x5f   : > { %1120 = vmatpush.msra.mxu2 %v1923_v43 }
  0x60   : > { %1907 = vmatmul.msk.f32.vlgmr.msra.gmra.mxu1 %vm204_vm0, %v873_v35 }
  0x61   : > { %1121 = vmatpush.msra.mxu2 %v1922_v45  ;;  %1191 = vmatpush.msra.mxu1 %v1927_v7  ;;  %v1958_v7 = vld [vmem:[%s2823_s2 + $0xb8] sm:$0xff] }
  0x62   : > { %1913 = vmatmul.msk.f32.vlgmr.msrb.gmra.mxu3 %vm204_vm0, %v873_v35 }
  0x63   : > { %1192 = vmatpush.msra.mxu1 %v1926_v48  ;;  %1315 = vmatpush.msrb.mxu3 %v1223_v0 }
  0x65   : > { %1316 = vmatpush.msrb.mxu3 %v1222_v3 }
  0x66   : > { %1906 = vmatmul.msk.f32.vlgmr.msra.gmra.mxu0 %vm204_vm0, %v844_v34  ;;  %1912 = vmatmul.msk.f32.vlgmr.msrb.gmra.mxu2 %vm204_vm0, %v844_v34 }
  0x67   : > { %1171 = vmatpush.msra.mxu0 %v1929_v2  ;;  %1270 = vmatpush.msrb.mxu2 %v1934_v49 }
  0x68   : > { %1919 = vmatmul.msk.f32.vlgmr.msrb.gmra.mxu1 %vm204_vm0, %v873_v35 }
  0x69   : > { %1172 = vmatpush.msra.mxu0 %v1928_v47  ;;  %1271 = vmatpush.msrb.mxu2 %v1933_v22  ;;  %v1964_v47 = vld [vmem:[%s2823_s2 + $0xc8] sm:$0xff] }
  0x6a   : > { %1925 = vmatmul.msk.f32.vlgmr.msra.gmra.mxu3 %vm204_vm0, %v873_v35  ;;  %1365 = vmatpush.msrb.mxu1 %v1938_v1 }
  0x6b   : > { %1416 = vmatpush.msra.mxu3 %v1944_v15 }
  0x6c   : > { %1366 = vmatpush.msrb.mxu1 %v1937_v4 }
  0x6d   : > { %1417 = vmatpush.msra.mxu3 %v1943_v16 }
  0x6e   : > { %1918 = vmatmul.msk.f32.vlgmr.msrb.gmra.mxu0 %vm204_vm0, %v844_v34  ;;  %1924 = vmatmul.msk.f32.vlgmr.msra.gmra.mxu2 %vm204_vm0, %v844_v34 }
  0x6f   : > { %1345 = vmatpush.msrb.mxu0 %v1940_v50  ;;  %1396 = vmatpush.msra.mxu2 %v1946_v55 }
  0x70   : > { %1931 = vmatmul.msk.f32.vlgmr.msra.gmra.mxu1 %vm204_vm0, %v873_v35 }
  0x71   : > { %1346 = vmatpush.msrb.mxu0 %v1939_v21  ;;  %1397 = vmatpush.msra.mxu2 %v1945_v57 }
  0x72   : > { %1467 = vmatpush.msra.mxu1 %v1950_v17 }
  0x74   : > { %1468 = vmatpush.msra.mxu1 %v1949_v26 }
  0x76   : > { %1930 = vmatmul.msk.f32.vlgmr.msra.gmra.mxu0 %vm204_vm0, %v844_v34 }
  0x77   : > { %1447 = vmatpush.msra.mxu0 %v1952_v56 }
  0x79   : > { %1448 = vmatpush.msra.mxu0 %v1951_v58 }
  0x8e   : > { %v334_v52 = vpop.xlane.xlu2 %333  ;;  %v330_v53 = vpop.xlane.xlu1 %329 }
  0x8f   : > { %v326_v54 = vpop.xlane.xlu0 %325  ;;  %v343_v8 = vmul.f32 %v330_v53, %v2427_v5  ;;  %v345_v18 = vmul.f32 %v334_v52, %v2427_v5  ;;  %v1957_v52 = vld [vmem:[%s2823_s2 + $0xb0] sm:$0xff]  ;;  %v1963_v53 = vld [vmem:[%s2823_s2 + $0xc0] sm:$0xff] }
  0x90   : > { %v341_v13 = vmul.f32 %v326_v54, %v2427_v5 }
  0x91   : > { %v1242_v20 = vperm.slane %v343_v8, %v2580_v6  ;;  %v1245_v29 = vperm.slane %v345_v18, %v2580_v6 }
  0x92   : > { %v1237_v27 = vperm.slane %v341_v13, %v2580_v6  ;;  %v1970_v13 = vld [vmem:[%s2823_s2 + $0xd8] sm:$0xff] }
  0x96   : > { %v336_v59 = vpop.xlane.xlu2 %335  ;;  %v332_v60 = vpop.xlane.xlu1 %331 }
  0x97   : > { %v328_v63 = vpop.xlane.xlu0 %327  ;;  %v344_v9 = vmul.f32 %v332_v60, %v2427_v5  ;;  %v346_v19 = vmul.f32 %v336_v59, %v2427_v5 }
  0x98   : > { %v342_v10 = vmul.f32 %v328_v63, %v2427_v5 }
  0x99   : > { %v1243_v23 = vperm.slane %v344_v9, %v2584_v62  ;;  %v1246_v30 = vperm.slane %v346_v19, %v2584_v62  ;;  %v1969_v19 = vld [vmem:[%s2823_s2 + $0xd0] sm:$0xff] }
  0x9a   : > { %v1239_v24 = vperm.slane %v342_v10, %v2584_v62 }
  0x9b   : > { %v1244_v32 = vsel %vm1240_vm6, %v1243_v23, %v1242_v20  ;;  %v1247_v39 = vsel %vm1240_vm6, %v1246_v30, %v1245_v29 }
  0x9c   : > { %v1241_v33 = vsel %vm1240_vm6, %v1239_v24, %v1237_v27 }
  0x9d   : > { %v406_v25 = vpop.f32.mrf.mxu1  ;;  %v1251_v41 = vsel %vm839_vm3, %v1244_v32, %v1241_v33 }
  0x9e   : > { %v2588_v11 = vpop.xlane.xlu2 %313  ;;  %v2590_v12 = vpop.xlane.xlu1 %311  ;;  %v1252_v2 = vsel %vm841_vm4, %v1247_v39, %v1251_v41 }
  0x9f   : > { %v2593_v14 = vpop.xlane.xlu0 %309  ;;  %v1287_v63 = vperm.slane %v2588_v11, %v2580_v6  ;;  %v1285_v15 = vperm.slane %v2590_v12, %v2584_v62 }
  0xa0   : > { %v1284_v11 = vperm.slane %v2593_v14, %v2580_v6 }
  0xa2   : > { %v1286_v26 = vsel %vm1240_vm6, %v1285_v15, %v1284_v11 }
  0xa3   : > { %v377_v28 = vpop.f32.mrf.mxu0  ;;  %v467_v42 = vpop.f32.mrf.mxu3 }
  0xa4   : > { %v407_v31 = vadd.f32 %v406_v25, %v377_v28 }
  0xa5   : > { %v409_v22 = vpop.f32.mrf.mxu1 }
  0xa6   : > { %v340_v34 = vpop.xlane.xlu2 %339  ;;  %v338_v35 = vpop.xlane.xlu1 %337  ;;  %v415_v51 = vrot.slane %v407_v31, 5 }
  0xa7   : > { %v348_v36 = vmul.f32 %v340_v34, %v2427_v5  ;;  %v347_v37 = vmul.f32 %v338_v35, %v2427_v5  ;;  %v316_v38 = vpop.xlane.xlu0 %315 }
  0xa8   : > { %v420_v48 = vsel %vm414_vm7, 0.0, %v415_v51  ;;  %v1288_v0 = vperm.slane %v316_v38, %v2584_v62  ;;  %v1962_v38 = vld [vmem:[%s2823_s2 + $0x58] sm:$0xff] }
  0xa9   : > { %v1249_v40 = vperm.slane %v348_v36, %v2584_v62  ;;  %v1248_v43 = vperm.slane %v347_v37, %v2580_v6  ;;  %v444_v44 = vpop.f32.mrf.mxu2 }
  0xaa   : > { %v468_v45 = vadd.f32 %v467_v42, %v444_v44  ;;  %v1289_v20 = vsel %vm1240_vm6, %v1288_v0, %v1287_v63  ;;  %v1955_v42 = vld [vmem:[%s2823_s2 + $0x40] sm:$0xff] }
  0xab   : > { %v1250_v46 = vsel %vm1240_vm6, %v1249_v40, %v1248_v43  ;;  %v380_v5 = vpop.f32.mrf.mxu0  ;;  %v470_v1 = vpop.f32.mrf.mxu3  ;;  %v1296_v29 = vsel %vm839_vm3, %v1289_v20, %v1286_v26  ;;  %v1961_v40 = vld [vmem:[%s2823_s2 + $0x50] sm:$0xff] }
  0xac   : > { %v2633_v49 = vsel %vm843_vm5, %v1250_v46, %v1252_v2  ;;  %v476_v50 = vrot.slane %v468_v45, 6  ;;  %v410_v21 = vadd.f32 %v409_v22, %v380_v5  ;;  %v1968_v5 = vld [vmem:[%s2823_s2 + $0x68] sm:$0xff] }
  0xad   : > { %1935 = vmatmul.msk.f32.vlgmr.msrb.gmra.mxu2 %vm204_vm0, %v2633_v49  ;;  %1941 = vmatmul.msk.f32.vlgmr.msrb.gmra.mxu0 %vm204_vm0, %v2633_v49  ;;  %v530_v16 = vpop.f32.mrf.mxu1 }
  0xae   : > { %v481_v54 = vsel %vm475_vm8, 0.0, %v476_v50  ;;  %1494 = vmatpush.msrb.mxu2 %v1958_v7  ;;  %1545 = vmatpush.msrb.mxu0 %v1964_v47  ;;  %v416_v56 = vrot.slane %v410_v21, 5  ;;  %v320_v58 = vpop.xlane.xlu1 %319  ;;  %v322_v10 = vpop.xlane.xlu2 %321 }
  0xaf   : > { %v482_v55 = vadd.f32 %v481_v54, %v420_v48  ;;  %v318_v57 = vpop.xlane.xlu0 %317  ;;  %v1291_v3 = vperm.slane %v320_v58, %v2584_v62  ;;  %v1293_v12 = vperm.slane %v322_v10, %v2580_v6 }
  0xb0   : > { %1495 = vmatpush.msrb.mxu2 %v1957_v52  ;;  %1546 = vmatpush.msrb.mxu0 %v1963_v53  ;;  %v417_v59 = vsel %vm414_vm7, %v415_v51, %v416_v56  ;;  %v1290_v4 = vperm.slane %v318_v57, %v2580_v6 }
  0xb1   : > { %v447_v60 = vpop.f32.mrf.mxu2 }
  0xb2   : > { %v471_v8 = vadd.f32 %v470_v1, %v447_v60  ;;  %v1292_v14 = vsel %vm1240_vm6, %v1291_v3, %v1290_v4 }
  0xb3   : > { %v507_v9 = vpop.f32.mrf.mxu0  ;;  %v1297_v6 = vsel %vm841_vm4, %v1292_v14, %v1296_v29  ;;  %v593_v34 = vpop.f32.mrf.mxu3 }
  0xb4   : > { %v477_v17 = vrot.slane %v471_v8, 6  ;;  %v531_v18 = vadd.f32 %v530_v16, %v507_v9 }
  0xb5   : > { %1947 = vmatmul.msk.f32.vlgmr.msra.gmra.mxu2 %vm204_vm0, %v2633_v49  ;;  %1953 = vmatmul.msk.f32.vlgmr.msra.gmra.mxu0 %vm204_vm0, %v2633_v49  ;;  %v533_v39 = vpop.f32.mrf.mxu1 }
  0xb6   : > { %1596 = vmatpush.msra.mxu2 %v1970_v13  ;;  %v478_v23 = vsel %vm475_vm8, %v476_v50, %v477_v17  ;;  %v539_v24 = vrot.slane %v531_v18, 7  ;;  %v1967_v50 = vld [vmem:[%s2823_s2 + $0x60] sm:$0xff] }
  0xb7   : > { %v324_v25 = vpop.xlane.xlu0 %323  ;;  %v483_v28 = vadd.f32 %v478_v23, %v417_v59 }
  0xb8   : > { %v1294_v27 = vperm.slane %v324_v25, %v2584_v62  ;;  %1597 = vmatpush.msra.mxu2 %v1969_v19  ;;  %v544_v30 = vsel %vm538_vm9, 0.0, %v539_v24  ;;  %v1956_v62 = vld [vmem:[%s2823_s2 + $0x48] sm:$0xff] }
  0xb9   : > { %v570_v31 = vpop.f32.mrf.mxu2  ;;  %v545_v32 = vadd.f32 %v544_v30, %v482_v55 }
  0xba   : > { %v1295_v33 = vsel %vm1240_vm6, %v1294_v27, %v1293_v12  ;;  %v594_v36 = vadd.f32 %v593_v34, %v570_v31 }
  0xbb   : > { %v1298_v35 = vsel %vm843_vm5, %v1295_v33, %v1297_v6  ;;  %v510_v37 = vpop.f32.mrf.mxu0  ;;  %v596_v2 = vpop.f32.mrf.mxu3 }
  0xbc   : > { %1936 = vmatmul.msk.f32.vlgmr.msrb.gmra.mxu3 %vm204_vm0, %v1298_v35  ;;  %1942 = vmatmul.msk.f32.vlgmr.msrb.gmra.mxu1 %vm204_vm0, %v1298_v35  ;;  %v599_v41 = vadd.f32 %v594_v36, %v545_v32  ;;  %v534_v51 = vadd.f32 %v533_v39, %v510_v37 }
  0xbd   : > { %1959 = vmatmul.msk.f32.vlgmr.msrb.gmra.mxu2 %vm204_vm0, %v2633_v49  ;;  %1965 = vmatmul.msk.f32.vlgmr.msrb.gmra.mxu0 %vm204_vm0, %v2633_v49  ;;  %v647_v48 = vpop.f32.mrf.mxu1 }
  0xbe   : > { %1514 = vmatpush.msrb.mxu3 %v1956_v62  ;;  %1565 = vmatpush.msrb.mxu1 %v1962_v38  ;;  %v540_v43 = vrot.slane %v534_v51, 7 }
  0xc0   : > { %1515 = vmatpush.msrb.mxu3 %v1955_v42  ;;  %1566 = vmatpush.msrb.mxu1 %v1961_v40  ;;  %v541_v45 = vsel %vm538_vm9, %v539_v24, %v540_v43 }
  0xc1   : > { %v573_v44 = vpop.f32.mrf.mxu2  ;;  %v546_v46 = vadd.f32 %v541_v45, %v483_v28 }
  0xc2   : > { %v597_v7 = vadd.f32 %v596_v2, %v573_v44 }
  0xc3   : > { %v624_v47 = vpop.f32.mrf.mxu0  ;;  %v710_v53 = vpop.f32.mrf.mxu3 }
  0xc4   : > { %1948 = vmatmul.msk.f32.vlgmr.msra.gmra.mxu3 %vm204_vm0, %v1298_v35  ;;  %1954 = vmatmul.msk.f32.vlgmr.msra.gmra.mxu1 %vm204_vm0, %v1298_v35  ;;  %v600_v22 = vadd.f32 %v597_v7, %v546_v46  ;;  %v648_v21 = vadd.f32 %v647_v48, %v624_v47 }
  0xc5   : > { %1971 = vmatmul.msk.f32.vlgmr.msra.gmra.mxu2 %vm204_vm0, %v2633_v49  ;;  %1616 = vmatpush.msra.mxu3 %v1968_v5  ;;  %v650_v56 = vpop.f32.mrf.mxu1 }
  0xc6   : > { %v656_v57 = vrot.slane %v648_v21, 1 }
  0xc7   : > { %1617 = vmatpush.msra.mxu3 %v1967_v50 }
  0xc9   : > { %v687_v52 = vpop.f32.mrf.mxu2 }
  0xca   : > { %v711_v54 = vadd.f32 %v710_v53, %v687_v52 }
  0xcb   : > { %v627_v55 = vpop.f32.mrf.mxu0  ;;  %v713_v3 = vpop.f32.mrf.mxu3 }
  0xcc   : > { %1960 = vmatmul.msk.f32.vlgmr.msrb.gmra.mxu3 %vm204_vm0, %v1298_v35  ;;  %1966 = vmatmul.msk.f32.vlgmr.msrb.gmra.mxu1 %vm204_vm0, %v1298_v35  ;;  %v651_v58 = vadd.f32 %v650_v56, %v627_v55  ;;  %v719_v4 = vrot.slane %v711_v54, 2 }
  0xcd   : > { %v773_v10 = vpop.f32.mrf.mxu1 }
  0xce   : > { %v657_v59 = vrot.slane %v651_v58, 1 }
  0xd0   : > { %v658_v60 = vsel %vm655_vm10, %v656_v57, %v657_v59  ;;  %v661_v63 = vsel %vm655_vm10, %v657_v59, 0.0 }
  0xd1   : > { %v690_v0 = vpop.f32.mrf.mxu2  ;;  %v662_v1 = vadd.f32 %v658_v60, %v599_v41  ;;  %v663_v49 = vadd.f32 %v661_v63, %v600_v22 }
  0xd2   : > { %v714_v8 = vadd.f32 %v713_v3, %v690_v0 }
  0xd3   : > { %v750_v9 = vpop.f32.mrf.mxu0  ;;  %v893_v20 = vpop.f32.mrf.mxu3 }
  0xd4   : > { %1972 = vmatmul.msk.f32.vlgmr.msra.gmra.mxu3 %vm204_vm0, %v1298_v35  ;;  %v720_v13 = vrot.slane %v714_v8, 2  ;;  %v774_v15 = vadd.f32 %v773_v10, %v750_v9 }
  0xd5   : > { %v776_v23 = vpop.f32.mrf.mxu1 }
  0xd6   : > { %v721_v11 = vsel %vm718_vm11, %v719_v4, %v720_v13  ;;  %v724_v16 = vsel %vm718_vm11, %v720_v13, 0.0  ;;  %v782_v24 = vrot.slane %v774_v15, 3 }
  0xd7   : > { %v725_v17 = vadd.f32 %v721_v11, %v662_v1  ;;  %v726_v18 = vadd.f32 %v724_v16, %v663_v49 }
  0xd9   : > { %v864_v19 = vpop.f32.mrf.mxu2 }
  0xda   : > { %v894_v12 = vadd.f32 %v893_v20, %v864_v19 }
  0xdb   : > { %v753_v14 = vpop.f32.mrf.mxu0 }
  0xdc   : > { %v777_v25 = vadd.f32 %v776_v23, %v753_v14  ;;  %v897_v27 = vrot.slane %v894_v12, 5 }
  0xdd   : > { %v943_v32 = vpop.f32.mrf.mxu3  ;;  %v994_v35 = vpop.f32.mrf.mxu1 }
  0xde   : > { %v783_v26 = vrot.slane %v777_v25, 3  ;;  %v899_v36 = vsel %vm414_vm7, 0.0, %v897_v27 }
  0xe0   : > { %v784_v28 = vsel %vm781_vm12, %v782_v24, %v783_v26  ;;  %v787_v29 = vsel %vm781_vm12, %v783_v26, 0.0 }
  0xe1   : > { %v923_v30 = vpop.f32.mrf.mxu2  ;;  %v788_v31 = vadd.f32 %v784_v28, %v725_v17  ;;  %v789_v6 = vadd.f32 %v787_v29, %v726_v18 }
  0xe2   : > { %v944_v33 = vadd.f32 %v943_v32, %v923_v30 }
  0xe3   : > { %v974_v34 = vpop.f32.mrf.mxu0  ;;  %v1890_v44 = vmul.f32 -1.442695, %v788_v31  ;;  %v1891_v2 = vmul.f32 -1.442695, %v789_v6 }
  0xe4   : > { %v947_v37 = vrot.slane %v944_v33, 6  ;;  %v995_v62 = vadd.f32 %v994_v35, %v974_v34 }
  0xe5   : > { %v1045_v43 = vpop.f32.mrf.mxu3  ;;  %v1092_v5 = vpop.f32.mrf.mxu1  ;;  %2032 = vpow2.f32 %v1890_v44 }
  0xe6   : > { %v949_v38 = vsel %vm475_vm8, 0.0, %v947_v37  ;;  %v998_v39 = vrot.slane %v995_v62, 7  ;;  %2034 = vpow2.f32 %v1891_v2 }
  0xe7   : > { %v950_v41 = vadd.f32 %v949_v38, %v899_v36 }
  0xe8   : > { %v1000_v51 = vsel %vm538_vm9, 0.0, %v998_v39 }
  0xe9   : > { %v1025_v42 = vpop.f32.mrf.mxu2  ;;  %v1001_v40 = vadd.f32 %v1000_v51, %v950_v41 }
  0xea   : > { %v1046_v45 = vadd.f32 %v1045_v43, %v1025_v42 }
  0xeb   : > { %v1072_v46 = vpop.f32.mrf.mxu0  ;;  %v2033_v56 = vpop.eup %2032 }
  0xec   : > { %v1048_v7 = vadd.f32 %v1046_v45, %v1001_v40  ;;  %v1093_v47 = vadd.f32 %v1092_v5, %v1072_v46  ;;  %v2035_v59 = vpop.eup %2034  ;;  %v798_v0 = vadd.f32 1.0, %v2033_v56 }
  0xed   : > { %v1143_v52 = vpop.f32.mrf.mxu3  ;;  %v1194_v55 = vpop.f32.mrf.mxu1  ;;  %v799_v49 = vadd.f32 1.0, %v2035_v59 }
  0xee   : > { %v1096_v48 = vrot.slane %v1093_v47, 1  ;;  %2036 = vrcp.f32 %v798_v0  ;;  %vm805_vm13 = vweird.f32 %v798_v0  ;;  %v809_v28 = vand.u32 2147483647, %v798_v0 }
  0xef   : > { %2038 = vrcp.f32 %v799_v49  ;;  %vm820_vm15 = vweird.f32 %v799_v49  ;;  %v826_v26 = vand.u32 2147483648, %v799_v49  ;;  %v811_v29 = vand.u32 2147483648, %v798_v0 }
  0xf0   : > { %v1098_v50 = vsel %vm414_vm7, %v1096_v48, 0.0  ;;  %v824_v6 = vand.u32 2147483647, %v799_v49  ;;  %vm810_vm11 = vcmp.eq.f32.partialorder %v809_v28, 8.507059e+37 }
  0xf1   : > { %v1123_v22 = vpop.f32.mrf.mxu2  ;;  %v1099_v21 = vadd.f32 %v1098_v50, %v1048_v7  ;;  %v827_v36 = vor.u32 1.1754944e-38, %v826_v26  ;;  %v812_v37 = vor.u32 1.1754944e-38, %v811_v29 }
  0xf2   : > { %v1144_v53 = vadd.f32 %v1143_v52, %v1123_v22  ;;  %vm825_vm12 = vcmp.eq.f32.partialorder %v824_v6, 8.507059e+37 }
  0xf3   : > { %v1174_v54 = vpop.f32.mrf.mxu0 }
  0xf4   : > { %v1147_v57 = vrot.slane %v1144_v53, 2  ;;  %v1195_v58 = vadd.f32 %v1194_v55, %v1174_v54  ;;  %v2037_v9 = vpop.eup %2036 }
  0xf5   : > { %v2039_v10 = vpop.eup %2038  ;;  %v801_v16 = vmul.f32 %v2037_v9, %v798_v0  ;;  %vm806_vm14 = vweird.f32 %v2037_v9 }
  0xf6   : > { %v1149_v60 = vsel %vm475_vm8, %v1147_v57, 0.0  ;;  %v1198_v63 = vrot.slane %v1195_v58, 3  ;;  %v816_v11 = vmul.f32 %v2039_v10, %v799_v49  ;;  %vm821_vm1 = vweird.f32 %v2039_v10  ;;  %vm2715_vm4 = vmor %vm805_vm13, %vm806_vm14 }
  0xf7   : > { %v1150_v1 = vadd.f32 %v1149_v60, %v1099_v21  ;;  %v802_v18 = vsub.f32 1.0, %v801_v16  ;;  %vm2719_vm5 = vmor %vm820_vm15, %vm821_vm1 }
  0xf8   : > { %v1200_v3 = vsel %vm538_vm9, %v1198_v63, 0.0  ;;  %v817_v17 = vsub.f32 1.0, %v816_v11 }
  0xf9   : > { %v1201_v4 = vadd.f32 %v1200_v3, %v1150_v1  ;;  %v803_v14 = vmul.f32 %v2037_v9, %v802_v18 }
  0xfa   : > { %v818_v12 = vmul.f32 %v2039_v10, %v817_v17 }
  0xfb   : > { %v1932_v8 = vmul.f32 -1.442695, %v1201_v4  ;;  %v804_v33 = vadd.f32 %v2037_v9, %v803_v14 }
  0xfc   : > { %v819_v30 = vadd.f32 %v2039_v10, %v818_v12 }
  0xfd   : > { %2040 = vpow2.f32 %v1932_v8  ;;  %v808_v39 = vsel %vm2715_vm4, %v2037_v9, %v804_v33  ;;  %v1669_v9 = vshrl.u32 %v1235_v61, 7 }
  0xfe   : > { %v823_v62 = vsel %vm2719_vm5, %v2039_v10, %v819_v30  ;;  %v813_v45 = vsel %vm810_vm11, %v812_v37, %v808_v39 }
  0xff   : > { %v828_v44 = vsel %vm825_vm12, %v827_v36, %v823_v62  ;;  %2026 = vset.pattern.permute.xlu0 %v1669_v9  ;;  %2024 = vset.pattern.permute.xlu1 %v1669_v9 }
 0x103   : > { %v2041_v13 = vpop.eup %2040 }
 0x104   : > { %v1206_v15 = vadd.f32 1.0, %v2041_v13  ;;  %v1676_v13 = vadd.s32 8, %v1669_v9  ;;  %v2050_v9 = vld [vmem:[%s2244_s23 + $0x28] sm:$0xff] }
 0x106   : > { %2042 = vrcp.f32 %v1206_v15  ;;  %v1218_v23 = vand.u32 2147483648, %v1206_v15  ;;  %vm1212_vm2 = vweird.f32 %v1206_v15  ;;  %v1216_v25 = vand.u32 2147483647, %v1206_v15  ;;  %2025 = vset.pattern.permute.xlu2 %v1676_v13 }
 0x108   : > { %v1219_v34 = vor.u32 1.1754944e-38, %v1218_v23  ;;  %vm1217_vm10 = vcmp.eq.f32.partialorder %v1216_v25, 8.507059e+37 }
 0x10c   : > { %v2043_v19 = vpop.eup %2042 }
 0x10d   : > { %v1208_v20 = vmul.f32 %v2043_v19, %v1206_v15  ;;  %vm1213_vm3 = vweird.f32 %v2043_v19 }
 0x10e   : > { %vm1214_vm6 = vmor %vm1212_vm2, %vm1213_vm3 }
 0x10f   : > { %v1209_v24 = vsub.f32 1.0, %v1208_v20 }
 0x111   : > { %v1210_v32 = vmul.f32 %v2043_v19, %v1209_v24 }
 0x113   : > { %v1211_v35 = vadd.f32 %v2043_v19, %v1210_v32 }
 0x115   : > { %v1215_v38 = vsel %vm1214_vm6, %v2043_v19, %v1211_v35 }
 0x116   : > { %v1220_v41 = vsel %vm1217_vm10, %v1219_v34, %v1215_v38 }
 0x117   : > { %v1651_v51 = vperm.slane %v1220_v41, 0  ;;  %v1648_v42 = vrot.slane %v1220_v41, 1  ;;  %v1649_v40 = vrot.slane %v1220_v41, 2  ;;  %v1650_v43 = vrot.slane %v1220_v41, 3 }
 0x119   : > { %v2727_v46 = vadd.f32 %v1651_v51, %v828_v44  ;;  %v1652_v2 = vperm.slane %v1648_v42, 0  ;;  %v1653_v5 = vperm.slane %v1649_v40, 0  ;;  %v1654_v7 = vperm.slane %v1650_v43, 0 }
 0x11a   : > { %v2729_v47 = vadd.f32 %v1651_v51, %v813_v45 }
 0x11b   : > { %v2731_v48 = vadd.f32 %v1652_v2, %v828_v44  ;;  %v2733_v50 = vadd.f32 %v1653_v5, %v828_v44  ;;  %v2735_v22 = vadd.f32 %v1652_v2, %v813_v45  ;;  %v2737_v21 = vadd.f32 %v1654_v7, %v828_v44 }
 0x11c   : > { %v2739_v52 = vadd.f32 %v1653_v5, %v813_v45  ;;  %v2741_v53 = vadd.f32 %v1654_v7, %v813_v45 }
 0x12a   : > { %v1348_v56 = vpop.f32.mrf.mxu0 }
 0x130   : > { %v1273_v54 = vpop.f32.mrf.mxu2 }
 0x132   : > { %v1450_v0 = vpop.f32.mrf.mxu0 }
 0x138   : > { %v1399_v58 = vpop.f32.mrf.mxu2 }
 0x139   : > { %v1368_v55 = vpop.f32.mrf.mxu1 }
 0x13a   : > { %v1369_v63 = vadd.f32 %v1368_v55, %v1348_v56  ;;  %v1548_v12 = vpop.f32.mrf.mxu0 }
 0x13c   : > { %v1372_v4 = vrot.slane %v1369_v63, 6 }
 0x13e   : > { %v1374_v11 = vsel %vm475_vm8, 0.0, %v1372_v4 }
 0x13f   : > { %v1318_v57 = vpop.f32.mrf.mxu3 }
 0x140   : > { %v1319_v59 = vadd.f32 %v1318_v57, %v1273_v54  ;;  %v1497_v15 = vpop.f32.mrf.mxu2 }
 0x141   : > { %v1470_v60 = vpop.f32.mrf.mxu1 }
 0x142   : > { %v1322_v49 = vrot.slane %v1319_v59, 5  ;;  %v1471_v61 = vadd.f32 %v1470_v60, %v1450_v0  ;;  %v2048_v59 = vld [vmem:[%s2244_s23 + $0x8] sm:$0xff] }
 0x144   : > { %v1324_v10 = vsel %vm414_vm7, 0.0, %v1322_v49  ;;  %v2049_v49 = vld [vmem:[%s2244_s23 + $0x18] sm:$0xff] }
 0x145   : > { %v1375_v17 = vadd.f32 %v1374_v11, %v1324_v10 }
 0x147   : > { %v1419_v1 = vpop.f32.mrf.mxu3 }
 0x148   : > { %v1420_v3 = vadd.f32 %v1419_v1, %v1399_v58  ;;  %v1599_v28 = vpop.f32.mrf.mxu2 }
 0x149   : > { %v1568_v18 = vpop.f32.mrf.mxu1 }
 0x14a   : > { %v1423_v8 = vrot.slane %v1420_v3, 7  ;;  %v1569_v23 = vadd.f32 %v1568_v18, %v1548_v12 }
 0x14c   : > { %v1425_v16 = vsel %vm538_vm9, 0.0, %v1423_v8  ;;  %v1572_v27 = vrot.slane %v1569_v23, 2 }
 0x14d   : > { %v1426_v14 = vadd.f32 %v1425_v16, %v1375_v17 }
 0x14e   : > { %v1574_v6 = vsel %vm475_vm8, %v1572_v27, 0.0 }
 0x14f   : > { %v1517_v19 = vpop.f32.mrf.mxu3  ;;  %v1473_v26 = vadd.f32 %v1471_v61, %v1426_v14  ;;  %v2052_v14 = vld [vmem:[%s2244_s23 + $0x38] sm:$0xff] }
 0x150   : > { %v1518_v20 = vadd.f32 %v1517_v19, %v1497_v15 }
 0x152   : > { %v1521_v24 = vrot.slane %v1518_v20, 1  ;;  %v2051_v20 = vld [vmem:[%s2244_s23 + $0x10] sm:$0xff] }
 0x154   : > { %v1523_v25 = vsel %vm414_vm7, %v1521_v24, 0.0  ;;  %v2053_v24 = vld [vmem:[%s2244_s23] sm:$0xff] }
 0x155   : > { %v1524_v29 = vadd.f32 %v1523_v25, %v1473_v26  ;;  %v2054_v25 = vld [vmem:[%s2244_s23 + $0x20] sm:$0xff] }
 0x157   : > { %v1619_v30 = vpop.f32.mrf.mxu3  ;;  %v1575_v33 = vadd.f32 %v1574_v6, %v1524_v29 }
 0x158   : > { %v1620_v31 = vadd.f32 %v1619_v30, %v1599_v28 }
 0x15a   : > { %v1623_v32 = vrot.slane %v1620_v31, 3 }
 0x15c   : > { %v1625_v34 = vsel %vm538_vm9, %v1623_v32, 0.0 }
 0x15d   : > { %v1626_v35 = vadd.f32 %v1625_v34, %v1575_v33 }
 0x15f   : > { %v1973_v36 = vmul.f32 -1.442695, %v1626_v35 }
 0x161   : > { %2044 = vpow2.f32 %v1973_v36 }
 0x167   : > { %v2045_v37 = vpop.eup %2044 }
 0x168   : > { %v1631_v62 = vadd.f32 1.0, %v2045_v37 }
 0x16a   : > { %2046 = vrcp.f32 %v1631_v62  ;;  %v1643_v51 = vand.u32 2147483648, %v1631_v62  ;;  %v1641_v40 = vand.u32 2147483647, %v1631_v62  ;;  %vm1637_vm13 = vweird.f32 %v1631_v62 }
 0x16c   : > { %v1644_v44 = vor.u32 1.1754944e-38, %v1643_v51  ;;  %vm1642_vm9 = vcmp.eq.f32.partialorder %v1641_v40, 8.507059e+37 }
 0x170   : > { %v2047_v38 = vpop.eup %2046 }
 0x171   : > { %v1633_v39 = vmul.f32 %v2047_v38, %v1631_v62  ;;  %vm1638_vm7 = vweird.f32 %v2047_v38 }
 0x172   : > { %vm1639_vm8 = vmor %vm1637_vm13, %vm1638_vm7 }
 0x173   : > { %v1634_v41 = vsub.f32 1.0, %v1633_v39 }
 0x175   : > { %v1635_v42 = vmul.f32 %v2047_v38, %v1634_v41 }
 0x177   : > { %v1636_v43 = vadd.f32 %v2047_v38, %v1635_v42 }
 0x179   : > { %v1640_v45 = vsel %vm1639_vm8, %v2047_v38, %v1636_v43 }
 0x17a   : > { %v1645_v2 = vsel %vm1642_vm9, %v1644_v44, %v1640_v45 }
 0x17b   : > { %v1680_v5 = vperm.slane %v1645_v2, 1  ;;  %v1667_v7 = vperm.slane %v1645_v2, 0  ;;  %v1693_v54 = vperm.slane %v1645_v2, 2  ;;  %v1706_v55 = vperm.slane %v1645_v2, 3 }
 0x17d   : > { %1685 = vperm.xlu0 %2026, %v1680_v5   ;;  %1678 = vperm.xlu2 %2025, %v1667_v7  }
 0x17e   : > { %1672 = vperm.xlu1 %2024, %v1667_v7  }
 0x185   : > { %1691 = vperm.xlu2 %2025, %v1680_v5   ;;  %2027 = vset.pattern.permute.xlu0 %v1676_v13 }
 0x186   : > { %1698 = vperm.xlu1 %2024, %v1693_v54  }
 0x18d   : > { %1704 = vperm.xlu2 %2025, %v1693_v54  }
 0x18e   : > { %1711 = vperm.xlu1 %2024, %v1706_v55  }
 0x195   : > { %1717 = vperm.xlu2 %2025, %v1706_v55  }
 0x1d7   : > { %v1679_v56 = vpop.permute.xlu2 %1678 }
 0x1d8   : > { %v1720_v57 = vadd.f32 %v1679_v56, %v2727_v46 }
 0x1da   : > { %v1728_v58 = vmul.f32 0.33333334, %v1720_v57 }
 0x1dc   : > { %v1736_v60 = vmul.f32 %v2048_v59, %v1728_v58 }
 0x1de   : > { %1744 = vst.msk [vmem:[%s2755_s20 + $0x8] sm:$0xff] %vm204_vm0, %v1736_v60 }
 0x1df   : > { %v1692_v63 = vpop.permute.xlu2 %1691 }
 0x1e0   : > { %v1722_v0 = vadd.f32 %v1692_v63, %v2731_v48 }
 0x1e2   : > { %v1730_v1 = vmul.f32 0.33333334, %v1722_v0 }
 0x1e4   : > { %v1738_v3 = vmul.f32 %v2049_v49, %v1730_v1 }
 0x1e6   : > { %1746 = vst.msk [vmem:[%s2755_s20 + $0x18] sm:$0xff] %vm204_vm0, %v1738_v3 }
 0x1e7   : > { %v1705_v46 = vpop.permute.xlu2 %1704 }
 0x1e8   : > { %v1724_v4 = vadd.f32 %v1705_v46, %v2733_v50 }
 0x1ea   : > { %v1732_v8 = vmul.f32 0.33333334, %v1724_v4 }
 0x1ec   : > { %v1740_v10 = vmul.f32 %v2050_v9, %v1732_v8 }
 0x1ee   : > { %1748 = vst.msk [vmem:[%s2755_s20 + $0x28] sm:$0xff] %vm204_vm0, %v1740_v10 }
 0x1ef   : > { %v1686_v13 = vpop.permute.xlu0 %1685  ;;  %v1718_v48 = vpop.permute.xlu2 %1717 }
 0x1f0   : > { %v1721_v15 = vadd.f32 %v1686_v13, %v2735_v22  ;;  %v1726_v11 = vadd.f32 %v1718_v48, %v2737_v21  ;;  %v1673_v16 = vpop.permute.xlu1 %1672 }
 0x1f1   : > { %v1719_v17 = vadd.f32 %v1673_v16, %v2729_v47 }
 0x1f2   : > { %v1729_v50 = vmul.f32 0.33333334, %v1721_v15  ;;  %v1734_v18 = vmul.f32 0.33333334, %v1726_v11 }
 0x1f3   : > { %v1727_v19 = vmul.f32 0.33333334, %v1719_v17 }
 0x1f4   : > { %v1737_v12 = vmul.f32 %v2051_v20, %v1729_v50  ;;  %v1742_v23 = vmul.f32 %v2052_v14, %v1734_v18 }
 0x1f5   : > { %v1735_v61 = vmul.f32 %v2053_v24, %v1727_v19 }
 0x1f6   : > { %1745 = vst.msk [vmem:[%s2755_s20 + $0x10] sm:$0xff] %vm204_vm0, %v1737_v12 }
 0x1f7   : > { %1750 = vst.msk [vmem:[%s2755_s20 + $0x38] sm:$0xff] %vm204_vm0, %v1742_v23 }
 0x1f8   : > { %1743 = vst.msk [vmem:[%s2755_s20] sm:$0xff] %vm204_vm0, %v1735_v61  ;;  %v1699_v47 = vpop.permute.xlu1 %1698 }
 0x1f9   : > { %v1723_v22 = vadd.f32 %v1699_v47, %v2739_v52  ;;  %v2055_v52 = vld [vmem:[%s2244_s23 + $0x30] sm:$0xff] }
 0x1fb   : > { %v1731_v21 = vmul.f32 0.33333334, %v1723_v22 }
 0x1fd   : > { %v1739_v26 = vmul.f32 %v2054_v25, %v1731_v21 }
 0x1ff   : > { %1747 = vst.msk [vmem:[%s2755_s20 + $0x20] sm:$0xff] %vm204_vm0, %v1739_v26 }
 0x200   : > { %v1712_v27 = vpop.permute.xlu1 %1711 }
 0x201   : > { %v1725_v28 = vadd.f32 %v1712_v27, %v2741_v53 }
 0x203   : > { %v1733_v29 = vmul.f32 0.33333334, %v1725_v28 }
 0x205   : > { %v1741_v30 = vmul.f32 %v2055_v52, %v1733_v29 }
 0x207   : > { %1749 = vst.msk [vmem:[%s2755_s20 + $0x30] sm:$0xff] %vm204_vm0, %v1741_v30 }
 0x208   : > { %2083 = shalt.err (!%p2080_p3)
}
 0x209   : > { %s2122_s23 = smov 128   ;;  %s2123_s12 = smov 8  }
 0x20a   : > { %1981 = dma.vmem_to_hbm [thread:$0]  (%p2187_p5), %s1765_s29, 1024, %s1767_s30, %s1752_s19, %s2122_s23, %s2122_s23, %s2123_s12  }
 0x20b PF: > { %p1987_p4 = scmp.ge.s32.totalorder %s2118_s18, 2  ;;  %s1781_s14 = sand.u32 1, %s2106_s15  }
 0x20c   : > { %s1782_s20 = scalar_lea.sflag [#allocation3], %s1781_s14 }
 0x20d   : > { %p1984_p7 = pnand %p1987_p4, %p2191_p6 }
 0x20f   : > { %p1985_p8 = pneg %p1984_p7 }
 0x211   : > { %2101 = dma.done.wait (%p1985_p8), %s1782_s20, 1024  }
 0x212   : > { %2103 = vsyncadd (%p1985_p8), %s1782_s20, 4294966272  ;;  %p14_p9 = scmp.ge.s32.totalorder %s2174_s21, 4   ;;  %s2832_s15 = smov %s2110_s16 }
 0x213   : > { %s2833_s16 = smov %s2114_s17  ;;  %s2834_s17 = smov %s2185_s24 }
 0x214   : > { %s2835_s18 = smov %s2174_s21  ;;  %16 = sbr.rel (!%p14_p9) target bundleno = 3 (0x3), region = 110 }
 0x219   :  { %1788 = vsyncpa [#allocation3], 1 }
 0x21a   :  { %1790 = vsyncpa [#allocation3 + $0x1], 1 }

</bundles_post_ra>
